<compile_context>
chip_gen: v7x
topology: tpu7x:2x2x1
jax: 0.10.0
libtpu: 0.0.40
codegen_flags: <defaults>
</compile_context>

<pallas_src>
import math
import functools

import jax
import jax.numpy as jnp
from jax import lax
from jax.experimental import pallas as pl
from jax.experimental.pallas import tpu as pltpu


# ----------------------------- Pallas kernel --------------------------------

def _layernorm(v, g, b, eps=1e-5):
    mu = jnp.mean(v, axis=-1, keepdims=True)
    var = jnp.mean((v - mu) ** 2, axis=-1, keepdims=True)
    return (v - mu) * lax.rsqrt(var + eps) * g + b


def decoder_layer_kernel(
    x_ref,                                   # (S, D) full-sequence rows (fp32)
    ln1_g_ref, ln1_b_ref,
    wq_ref, bq_ref, wkv_ref, bkv_ref, wo_ref, bo_ref,
    ln2_g_ref, ln2_b_ref,
    w1_ref, b1_ref, w2_ref, b2_ref,
    out_ref,                                 # (TQ, D) query-row tile (fp32)
    kv_sc,                                   # VMEM (S, 2D) bf16: cached K | V
    ctx_sc,                                  # VMEM (TQ, D) bf16: per-head context
    *, num_heads: int,
):
    f32 = jnp.float32
    bf16 = jnp.bfloat16

    S, D = x_ref.shape
    TQ = out_ref.shape[0]
    dh = D // num_heads
    qi = pl.program_id(1)

    # ---- cache K/V for the whole sequence, once per batch element ----------
    # qi axis is "arbitrary" (sequential), so qi == 0 runs first for each b.
    @pl.when(qi == 0)
    def _():
        xn_full = _layernorm(x_ref[...], ln1_g_ref[...], ln1_b_ref[...])
        # 1/sqrt(dh) is folded into wq/bq (not K), so K/V need no scaling here.
        kv = jnp.dot(xn_full.astype(bf16), wkv_ref[...],
                     preferred_element_type=f32) + bkv_ref[...]      # (S, 2D)
        kv_sc[...] = kv.astype(bf16)

    # ---- sub-layer 1: x + SelfAttn(LN1(x)) for this query-row tile ---------
    q_start = pl.multiple_of(qi * TQ, TQ)
    xq = x_ref[pl.ds(q_start, TQ), :]                                # (TQ, D) fp32
    xq_n = _layernorm(xq, ln1_g_ref[...], ln1_b_ref[...])
    q = jnp.dot(xq_n.astype(bf16), wq_ref[...],
                preferred_element_type=f32) + bq_ref[...]            # (TQ, D)
    q = q.astype(bf16)                                               # cast once

    # Causal additive mask generated in-kernel (no (S,S) HBM mask traffic),
    # hoisted out of the head loop.
    # TODO(synk): arbitrary padding masks would arrive as per-row lengths via
    # scalar prefetch instead of a dense mask.
    row = lax.broadcasted_iota(jnp.int32, (TQ, S), 0) + q_start
    col = lax.broadcasted_iota(jnp.int32, (TQ, S), 1)
    mask_bias = jnp.where(col <= row, 0.0, -1e9).astype(f32)         # (TQ, S)

    # Per-head attention; each head's context goes into a lane-contiguous bf16
    # buffer so the output projection is a single full-K matmul afterwards.
    # TODO(synk): switch to lax.fori_loop + key-tiled online softmax (flash
    # style, causal block skipping) for long S / v7x's 64 MiB VMEM; kept as a
    # static unroll with static lane slices for lowering robustness here.
    for h in range(num_heads):
        lo = h * dh
        qh = q[:, lo:lo + dh]                                        # (TQ, dh) bf16
        kh = kv_sc[:, lo:lo + dh]                                    # (S,  dh) bf16
        vh = kv_sc[:, D + lo:D + lo + dh]                            # (S,  dh) bf16
        s = lax.dot_general(qh, kh, (((1,), (1,)), ((), ())),
                            preferred_element_type=f32)              # (TQ, S)
        s = s + mask_bias
        s = s - jnp.max(s, axis=-1, keepdims=True)
        p = jnp.exp(s)                                               # fp32 (v5e-safe)
        p = p * pl.reciprocal(jnp.sum(p, axis=-1, keepdims=True), approx=True)
        oh = jnp.dot(p.astype(bf16), vh, preferred_element_type=f32)  # (TQ, dh)
        ctx_sc[:, lo:lo + dh] = oh.astype(bf16)

    attn = jnp.dot(ctx_sc[...], wo_ref[...],
                   preferred_element_type=f32) + bo_ref[...]         # one K=D matmul

    # TODO(synk): nn.Dropout is identity in eval mode; no stochastic drop here.
    x1 = xq + attn

    # ---- sub-layer 2: x + FFN(LN2(x)) ---------------------------------------
    x1_n = _layernorm(x1, ln2_g_ref[...], ln2_b_ref[...])
    h1 = jnp.dot(x1_n.astype(bf16), w1_ref[...],
                 preferred_element_type=f32) + b1_ref[...]
    h1 = jnp.maximum(h1, 0.0)                                        # ReLU
    ffn = jnp.dot(h1.astype(bf16), w2_ref[...],
                  preferred_element_type=f32) + b2_ref[...]

    out_ref[...] = (x1 + ffn).astype(out_ref.dtype)


# ------------------------------ wrapper --------------------------------------

def _vmem_limit_bytes():
    # Physical VMEM: v5e/v6e = 128 MiB, v7x = 64 MiB per TC; scoped defaults are
    # only 16/32 MiB. Raise explicitly, leaving per-generation headroom.
    try:
        kind = jax.devices()[0].device_kind.lower()
    except Exception:
        kind = ""
    if "v7" in kind or "7x" in kind:
        return 48 * 1024 * 1024
    if any(t in kind for t in ("v5", "v6")):
        return 96 * 1024 * 1024
    return 64 * 1024 * 1024


def decoder_only_layer(x, params, *, num_heads, q_block=None):
    """x: (B, S, D) fp32. Causal mask generated inside the kernel."""
    B, S, D = x.shape
    F = params["w1"].shape[1]
    assert D % num_heads == 0
    dh = D // num_heads

    # Default to a real query tile so the qi axis pipelines / parallelizes and
    # activations + FFN intermediate stay bounded at long S.
    if q_block is None:
        TQ = 256 if (S % 256 == 0) else S
    else:
        TQ = q_block
    assert S % TQ == 0
    nq = S // TQ

    bf16 = jnp.bfloat16
    f32 = jnp.float32
    scale = 1.0 / math.sqrt(dh)

    # Weight prep: fold attention scale into Q proj, fuse K/V into one weight,
    # cast matmul weights to bf16 (halves weight DMA / VMEM); biases & LN fp32.
    # TODO(synk): optional fp8 w1/w2 with per-channel scales on v7x.
    wq = (params["wq"] * scale).astype(bf16)
    bq = (params["bq"] * scale).astype(f32)
    wkv = jnp.concatenate([params["wk"], params["wv"]], axis=1).astype(bf16)
    bkv = jnp.concatenate([params["bk"], params["bv"]], axis=1).astype(f32)
    wo = params["wo"].astype(bf16)
    w1 = params["w1"].astype(bf16)
    w2 = params["w2"].astype(bf16)

    args = (
        x,
        params["ln1_g"], params["ln1_b"],
        wq, bq, wkv, bkv, wo, params["bo"],
        params["ln2_g"], params["ln2_b"],
        w1, params["b1"], w2, params["b2"],
    )

    kernel = functools.partial(decoder_layer_kernel, num_heads=num_heads)

    def _run(single_buffer_weights: bool):
        def wspec(shape):
            # Grid-invariant weights (constant index_map) -> one VMEM buffer is
            # enough; default double-buffering only wastes VMEM.
            if single_buffer_weights:
                return pl.BlockSpec(shape, lambda b, qi: (0, 0),
                                    pipeline_mode=pl.Buffered(buffer_count=1))
            return pl.BlockSpec(shape, lambda b, qi: (0, 0))

        in_specs = [
            # Full-sequence x (grid-invariant over qi -> fetched once per batch
            # element); query rows are sliced out of it inside the kernel.
            pl.BlockSpec((None, S, D), lambda b, qi: (b, 0, 0)),
            wspec((1, D)), wspec((1, D)),          # ln1 gamma, beta
            wspec((D, D)), wspec((1, D)),          # wq (scaled), bq (scaled)
            wspec((D, 2 * D)), wspec((1, 2 * D)),  # fused wkv, bkv
            wspec((D, D)), wspec((1, D)),          # wo, bo
            wspec((1, D)), wspec((1, D)),          # ln2 gamma, beta
            wspec((D, F)), wspec((1, F)),          # w1, b1
            wspec((F, D)), wspec((1, D)),          # w2, b2
        ]

        return pl.pallas_call(
            kernel,
            out_shape=jax.ShapeDtypeStruct((B, S, D), x.dtype),
            grid_spec=pltpu.PrefetchScalarGridSpec(
                num_scalar_prefetch=0,
                grid=(B, nq),
                in_specs=in_specs,
                out_specs=pl.BlockSpec((None, TQ, D), lambda b, qi: (b, qi, 0)),
                scratch_shapes=[
                    pltpu.VMEM((S, 2 * D), bf16),   # cached K | V (per batch elt)
                    pltpu.VMEM((TQ, D), bf16),      # per-head context assembly
                ],
            ),
            compiler_params=pltpu.CompilerParams(
                # qi must be "arbitrary": the K/V scratch written at qi == 0 is
                # reused by later qi steps of the same batch element.
                dimension_semantics=("parallel", "arbitrary"),
                vmem_limit_bytes=_vmem_limit_bytes(),
            ),
        )(*args)

    try:
        return _run(True)
    except (TypeError, NotImplementedError, pltpu.LoweringException):
        # Only if this JAX build rejects pipeline_mode=pl.Buffered(1) on weights.
        return _run(False)


# ------------------------- pure-JAX reference ---------------------------------

def reference(x, add_mask, params, *, num_heads):
    def ln(v, g, b, eps=1e-5):
        mu = v.mean(-1, keepdims=True)
        var = ((v - mu) ** 2).mean(-1, keepdims=True)
        return (v - mu) / jnp.sqrt(var + eps) * g + b

    B, S, D = x.shape
    dh = D // num_heads
    xn = ln(x, params["ln1_g"], params["ln1_b"])
    q = xn @ params["wq"] + params["bq"]
    k = xn @ params["wk"] + params["bk"]
    v = xn @ params["wv"] + params["bv"]
    q = q.reshape(B, S, num_heads, dh).transpose(0, 2, 1, 3)
    k = k.reshape(B, S, num_heads, dh).transpose(0, 2, 1, 3)
    v = v.reshape(B, S, num_heads, dh).transpose(0, 2, 1, 3)
    s = jnp.einsum("bhqd,bhkd->bhqk", q, k) / math.sqrt(dh) + add_mask[:, None]
    p = jax.nn.softmax(s, axis=-1)
    attn = jnp.einsum("bhqk,bhkd->bhqd", p, v).transpose(0, 2, 1, 3).reshape(B, S, D)
    attn = attn @ params["wo"] + params["bo"]
    x1 = x + attn
    xn2 = ln(x1, params["ln2_g"], params["ln2_b"])
    ffn = jnp.maximum(xn2 @ params["w1"] + params["b1"], 0.0) @ params["w2"] + params["b2"]
    return x1 + ffn


# --------------------------------- main ---------------------------------------

if __name__ == "__main__":
    B, S, D, H, F = 2, 16, 32, 4, 64   # batch, seq, d_model, heads, d_ff

    key = jax.random.PRNGKey(0)
    ks = jax.random.split(key, 16)

    def init(k, shape, scale=0.05):
        return (scale * jax.random.normal(k, shape)).astype(jnp.float32)

    params = {
        "ln1_g": jnp.ones((1, D), jnp.float32),
        "ln1_b": jnp.zeros((1, D), jnp.float32),
        "wq": init(ks[0], (D, D)), "bq": init(ks[1], (1, D)),
        "wk": init(ks[2], (D, D)), "bk": init(ks[3], (1, D)),
        "wv": init(ks[4], (D, D)), "bv": init(ks[5], (1, D)),
        "wo": init(ks[6], (D, D)), "bo": init(ks[7], (1, D)),
        "ln2_g": jnp.ones((1, D), jnp.float32),
        "ln2_b": jnp.zeros((1, D), jnp.float32),
        "w1": init(ks[8], (D, F)), "b1": init(ks[9], (1, F)),
        "w2": init(ks[10], (F, D)), "b2": init(ks[11], (1, D)),
    }

    x = jax.random.normal(ks[12], (B, S, D), dtype=jnp.float32)

    # causal additive mask (only for the pure-JAX reference; kernel builds its own)
    causal = jnp.tril(jnp.ones((S, S), jnp.float32))
    add_mask = jnp.where(causal > 0, 0.0, -1e9)[None]   # (1, S, S)

    # q_block=8 -> two query tiles per batch element: exercises the cached-K/V
    # path (pl.when(qi == 0)) and the dynamic query-row slicing.
    out = decoder_only_layer(x, params, num_heads=H, q_block=8)
    out = jax.block_until_ready(out)

    ref = reference(x, add_mask, params, num_heads=H)
    assert out.shape == (B, S, D)
    # bf16 MXU inputs + approx reciprocal -> slightly looser tolerance than fp32.
    assert jnp.allclose(out, ref, atol=2e-2, rtol=2e-2), "mismatch vs reference"

    print("KERNEL_OK")
</pallas_src>

<mosaic_0001>
module attributes {stable_mosaic.version = 11 : i64} {
  func.func @decoder_layer_kernel(%arg0: i32, %arg1: i32, %arg2: memref<1x16x32xf32, #tpu.memory_space<vmem>>, %arg3: memref<1x32xf32, #tpu.memory_space<vmem>>, %arg4: memref<1x32xf32, #tpu.memory_space<vmem>>, %arg5: memref<32x32xbf16, #tpu.memory_space<vmem>>, %arg6: memref<1x32xf32, #tpu.memory_space<vmem>>, %arg7: memref<32x64xbf16, #tpu.memory_space<vmem>>, %arg8: memref<1x64xf32, #tpu.memory_space<vmem>>, %arg9: memref<32x32xbf16, #tpu.memory_space<vmem>>, %arg10: memref<1x32xf32, #tpu.memory_space<vmem>>, %arg11: memref<1x32xf32, #tpu.memory_space<vmem>>, %arg12: memref<1x32xf32, #tpu.memory_space<vmem>>, %arg13: memref<32x64xbf16, #tpu.memory_space<vmem>>, %arg14: memref<1x64xf32, #tpu.memory_space<vmem>>, %arg15: memref<64x32xbf16, #tpu.memory_space<vmem>>, %arg16: memref<1x32xf32, #tpu.memory_space<vmem>>, %arg17: memref<1x8x32xf32, #tpu.memory_space<vmem>>, %arg18: memref<16x64xbf16, #tpu.memory_space<vmem>>, %arg19: memref<8x32xbf16, #tpu.memory_space<vmem>>) attributes {dimension_semantics = [#tpu.dimension_semantics<parallel>, #tpu.dimension_semantics<arbitrary>], iteration_bounds = array<i64: 2, 2>, scalar_prefetch = 0 : i64, scratch_operands = 2 : i64, tpu.core_type = #tpu.core_type<tc>, window_params = [{transform_indices = @transform_0, window_bounds = array<i64: 1, 16, 32>}, {pipeline_mode = #tpu.pipeline_mode<synchronous>, transform_indices = @transform_1, window_bounds = array<i64: 1, 32>}, {pipeline_mode = #tpu.pipeline_mode<synchronous>, transform_indices = @transform_2, window_bounds = array<i64: 1, 32>}, {pipeline_mode = #tpu.pipeline_mode<synchronous>, transform_indices = @transform_3, window_bounds = array<i64: 32, 32>}, {pipeline_mode = #tpu.pipeline_mode<synchronous>, transform_indices = @transform_4, window_bounds = array<i64: 1, 32>}, {pipeline_mode = #tpu.pipeline_mode<synchronous>, transform_indices = @transform_5, window_bounds = array<i64: 32, 64>}, {pipeline_mode = #tpu.pipeline_mode<synchronous>, transform_indices = @transform_6, window_bounds = array<i64: 1, 64>}, {pipeline_mode = #tpu.pipeline_mode<synchronous>, transform_indices = @transform_7, window_bounds = array<i64: 32, 32>}, {pipeline_mode = #tpu.pipeline_mode<synchronous>, transform_indices = @transform_8, window_bounds = array<i64: 1, 32>}, {pipeline_mode = #tpu.pipeline_mode<synchronous>, transform_indices = @transform_9, window_bounds = array<i64: 1, 32>}, {pipeline_mode = #tpu.pipeline_mode<synchronous>, transform_indices = @transform_10, window_bounds = array<i64: 1, 32>}, {pipeline_mode = #tpu.pipeline_mode<synchronous>, transform_indices = @transform_11, window_bounds = array<i64: 32, 64>}, {pipeline_mode = #tpu.pipeline_mode<synchronous>, transform_indices = @transform_12, window_bounds = array<i64: 1, 64>}, {pipeline_mode = #tpu.pipeline_mode<synchronous>, transform_indices = @transform_13, window_bounds = array<i64: 64, 32>}, {pipeline_mode = #tpu.pipeline_mode<synchronous>, transform_indices = @transform_14, window_bounds = array<i64: 1, 32>}, {transform_indices = @transform_15, window_bounds = array<i64: 1, 8, 32>}]} {
    %c0_i32 = arith.constant 0 : i32
    %0 = arith.cmpi eq, %arg1, %c0_i32 : i32
    %1 = arith.extui %0 : i1 to i32
    %c0_i32_0 = arith.constant 0 : i32
    %2 = arith.cmpi ne, %1, %c0_i32_0 : i32
    scf.if %2 {
      %c0_80 = arith.constant 0 : index
      %c0_81 = arith.constant 0 : index
      %c0_82 = arith.constant 0 : index
      %172 = vector.load %arg2[%c0_80, %c0_81, %c0_82] : memref<1x16x32xf32, #tpu.memory_space<vmem>>, vector<1x16x32xf32>
      %173 = vector.shape_cast %172 : vector<1x16x32xf32> to vector<16x32xf32>
      %c0_83 = arith.constant 0 : index
      %c0_84 = arith.constant 0 : index
      %174 = vector.load %arg3[%c0_83, %c0_84] : memref<1x32xf32, #tpu.memory_space<vmem>>, vector<1x32xf32>
      %c0_85 = arith.constant 0 : index
      %c0_86 = arith.constant 0 : index
      %175 = vector.load %arg4[%c0_85, %c0_86] : memref<1x32xf32, #tpu.memory_space<vmem>>, vector<1x32xf32>
      %cst_87 = arith.constant dense<0.000000e+00> : vector<16xf32>
      %176 = vector.multi_reduction <add>, %173, %cst_87 [1] : vector<16x32xf32> to vector<16xf32>
      %177 = vector.shape_cast %176 : vector<16xf32> to vector<16x1xf32>
      %cst_88 = arith.constant 3.200000e+01 : f32
      %178 = vector.broadcast %cst_88 : f32 to vector<16x1xf32>
      %179 = arith.divf %177, %178 : vector<16x1xf32>
      %180 = vector.broadcast %179 : vector<16x1xf32> to vector<16x32xf32>
      %181 = arith.subf %173, %180 : vector<16x32xf32>
      %182 = arith.mulf %181, %181 : vector<16x32xf32>
      %cst_89 = arith.constant dense<0.000000e+00> : vector<16xf32>
      %183 = vector.multi_reduction <add>, %182, %cst_89 [1] : vector<16x32xf32> to vector<16xf32>
      %184 = vector.shape_cast %183 : vector<16xf32> to vector<16x1xf32>
      %cst_90 = arith.constant 3.200000e+01 : f32
      %185 = vector.broadcast %cst_90 : f32 to vector<16x1xf32>
      %186 = arith.divf %184, %185 : vector<16x1xf32>
      %187 = vector.broadcast %179 : vector<16x1xf32> to vector<16x32xf32>
      %188 = arith.subf %173, %187 : vector<16x32xf32>
      %cst_91 = arith.constant 9.99999974E-6 : f32
      %189 = vector.broadcast %cst_91 : f32 to vector<16x1xf32>
      %190 = arith.addf %186, %189 : vector<16x1xf32>
      %191 = math.rsqrt %190 : vector<16x1xf32>
      %192 = vector.broadcast %191 : vector<16x1xf32> to vector<16x32xf32>
      %193 = arith.mulf %188, %192 : vector<16x32xf32>
      %194 = vector.broadcast %174 : vector<1x32xf32> to vector<16x32xf32>
      %195 = arith.mulf %193, %194 : vector<16x32xf32>
      %196 = vector.broadcast %175 : vector<1x32xf32> to vector<16x32xf32>
      %197 = arith.addf %195, %196 : vector<16x32xf32>
      %198 = arith.truncf %197 : vector<16x32xf32> to vector<16x32xbf16>
      %c0_92 = arith.constant 0 : index
      %c0_93 = arith.constant 0 : index
      %199 = vector.load %arg7[%c0_92, %c0_93] : memref<32x64xbf16, #tpu.memory_space<vmem>>, vector<32x64xbf16>
      %cst_94 = arith.constant dense<0.000000e+00> : vector<16x64xf32>
      %200 = tpu.matmul %198, %199, %cst_94 {dimension_numbers = #tpu.dot_dimension_numbers<[1], [0], [0], [1], [0, 0, 1, 1], [], []>} : vector<16x32xbf16>, vector<32x64xbf16>, vector<16x64xf32> -> vector<16x64xf32>
      %c0_95 = arith.constant 0 : index
      %c0_96 = arith.constant 0 : index
      %201 = vector.load %arg8[%c0_95, %c0_96] : memref<1x64xf32, #tpu.memory_space<vmem>>, vector<1x64xf32>
      %202 = vector.broadcast %201 : vector<1x64xf32> to vector<16x64xf32>
      %203 = arith.addf %200, %202 : vector<16x64xf32>
      %204 = arith.truncf %203 : vector<16x64xf32> to vector<16x64xbf16>
      %c0_97 = arith.constant 0 : index
      %c0_98 = arith.constant 0 : index
      %205 = vector.load %arg18[%c0_97, %c0_98] : memref<16x64xbf16, #tpu.memory_space<vmem>>, vector<16x64xbf16>
      tpu.vector_store %arg18[%c0_97, %c0_98], %204 {strides = array<i32>} : memref<16x64xbf16, #tpu.memory_space<vmem>>, vector<16x64xbf16>,
    } else {
    }
    %c8_i32 = arith.constant 8 : i32
    %3 = arith.muli %arg1, %c8_i32 : i32
    %4 = tpu.assume_multiple %3, 8 : i32
    %c0 = arith.constant 0 : index
    %5 = arith.index_cast %4 : i32 to index
    %c0_1 = arith.constant 0 : index
    %6 = vector.load %arg2[%c0, %5, %c0_1] : memref<1x16x32xf32, #tpu.memory_space<vmem>>, vector<1x8x32xf32>
    %7 = vector.shape_cast %6 : vector<1x8x32xf32> to vector<8x32xf32>
    %c0_2 = arith.constant 0 : index
    %c0_3 = arith.constant 0 : index
    %8 = vector.load %arg3[%c0_2, %c0_3] : memref<1x32xf32, #tpu.memory_space<vmem>>, vector<1x32xf32>
    %c0_4 = arith.constant 0 : index
    %c0_5 = arith.constant 0 : index
    %9 = vector.load %arg4[%c0_4, %c0_5] : memref<1x32xf32, #tpu.memory_space<vmem>>, vector<1x32xf32>
    %cst = arith.constant dense<0.000000e+00> : vector<8xf32>
    %10 = vector.multi_reduction <add>, %7, %cst [1] : vector<8x32xf32> to vector<8xf32>
    %11 = vector.shape_cast %10 : vector<8xf32> to vector<8x1xf32>
    %cst_6 = arith.constant 3.200000e+01 : f32
    %12 = vector.broadcast %cst_6 : f32 to vector<8x1xf32>
    %13 = arith.divf %11, %12 : vector<8x1xf32>
    %14 = vector.broadcast %13 : vector<8x1xf32> to vector<8x32xf32>
    %15 = arith.subf %7, %14 : vector<8x32xf32>
    %16 = arith.mulf %15, %15 : vector<8x32xf32>
    %cst_7 = arith.constant dense<0.000000e+00> : vector<8xf32>
    %17 = vector.multi_reduction <add>, %16, %cst_7 [1] : vector<8x32xf32> to vector<8xf32>
    %18 = vector.shape_cast %17 : vector<8xf32> to vector<8x1xf32>
    %cst_8 = arith.constant 3.200000e+01 : f32
    %19 = vector.broadcast %cst_8 : f32 to vector<8x1xf32>
    %20 = arith.divf %18, %19 : vector<8x1xf32>
    %21 = vector.broadcast %13 : vector<8x1xf32> to vector<8x32xf32>
    %22 = arith.subf %7, %21 : vector<8x32xf32>
    %cst_9 = arith.constant 9.99999974E-6 : f32
    %23 = vector.broadcast %cst_9 : f32 to vector<8x1xf32>
    %24 = arith.addf %20, %23 : vector<8x1xf32>
    %25 = math.rsqrt %24 : vector<8x1xf32>
    %26 = vector.broadcast %25 : vector<8x1xf32> to vector<8x32xf32>
    %27 = arith.mulf %22, %26 : vector<8x32xf32>
    %28 = vector.broadcast %8 : vector<1x32xf32> to vector<8x32xf32>
    %29 = arith.mulf %27, %28 : vector<8x32xf32>
    %30 = vector.broadcast %9 : vector<1x32xf32> to vector<8x32xf32>
    %31 = arith.addf %29, %30 : vector<8x32xf32>
    %32 = arith.truncf %31 : vector<8x32xf32> to vector<8x32xbf16>
    %c0_10 = arith.constant 0 : index
    %c0_11 = arith.constant 0 : index
    %33 = vector.load %arg5[%c0_10, %c0_11] : memref<32x32xbf16, #tpu.memory_space<vmem>>, vector<32x32xbf16>
    %cst_12 = arith.constant dense<0.000000e+00> : vector<8x32xf32>
    %34 = tpu.matmul %32, %33, %cst_12 {dimension_numbers = #tpu.dot_dimension_numbers<[1], [0], [0], [1], [0, 0, 1, 1], [], []>} : vector<8x32xbf16>, vector<32x32xbf16>, vector<8x32xf32> -> vector<8x32xf32>
    %c0_13 = arith.constant 0 : index
    %c0_14 = arith.constant 0 : index
    %35 = vector.load %arg6[%c0_13, %c0_14] : memref<1x32xf32, #tpu.memory_space<vmem>>, vector<1x32xf32>
    %36 = vector.broadcast %35 : vector<1x32xf32> to vector<8x32xf32>
    %37 = arith.addf %34, %36 : vector<8x32xf32>
    %38 = arith.truncf %37 : vector<8x32xf32> to vector<8x32xbf16>
    %39 = tpu.iota {dimensions = array<i32: 0>} : vector<8x16xi32>
    %40 = vector.broadcast %4 : i32 to vector<8x16xi32>
    %41 = arith.addi %39, %40 : vector<8x16xi32>
    %42 = tpu.iota {dimensions = array<i32: 1>} : vector<8x16xi32>
    %43 = arith.cmpi sle, %42, %41 : vector<8x16xi32>
    %cst_15 = arith.constant 0.000000e+00 : f32
    %cst_16 = arith.constant -1.000000e+09 : f32
    %44 = vector.broadcast %cst_15 : f32 to vector<8x16xf32>
    %45 = vector.broadcast %cst_16 : f32 to vector<8x16xf32>
    %46 = arith.select %43, %44, %45 : vector<8x16xi1>, vector<8x16xf32>
    %47 = vector.extract_strided_slice %38 {offsets = [0, 0], sizes = [8, 8], strides = [1, 1]} : vector<8x32xbf16> to vector<8x8xbf16>
    %c0_17 = arith.constant 0 : index
    %c0_18 = arith.constant 0 : index
    %48 = vector.load %arg18[%c0_17, %c0_18] : memref<16x64xbf16, #tpu.memory_space<vmem>>, vector<16x8xbf16>
    %c0_19 = arith.constant 0 : index
    %c32 = arith.constant 32 : index
    %49 = vector.load %arg18[%c0_19, %c32] : memref<16x64xbf16, #tpu.memory_space<vmem>>, vector<16x8xbf16>
    %cst_20 = arith.constant dense<0.000000e+00> : vector<8x16xf32>
    %50 = tpu.matmul %47, %48, %cst_20 {dimension_numbers = #tpu.dot_dimension_numbers<[1], [1], [0], [0], [0, 0, 1, 0], [], []>} : vector<8x8xbf16>, vector<16x8xbf16>, vector<8x16xf32> -> vector<8x16xf32>
    %51 = arith.addf %50, %46 : vector<8x16xf32>
    %cst_21 = arith.constant dense<0xFF800000> : vector<8xf32>
    %52 = vector.multi_reduction <maximumf>, %51, %cst_21 [1] : vector<8x16xf32> to vector<8xf32>
    %53 = vector.shape_cast %52 : vector<8xf32> to vector<8x1xf32>
    %54 = vector.broadcast %53 : vector<8x1xf32> to vector<8x16xf32>
    %55 = arith.subf %51, %54 : vector<8x16xf32>
    %56 = math.exp %55 : vector<8x16xf32>
    %cst_22 = arith.constant dense<0.000000e+00> : vector<8xf32>
    %57 = vector.multi_reduction <add>, %56, %cst_22 [1] : vector<8x16xf32> to vector<8xf32>
    %58 = vector.shape_cast %57 : vector<8xf32> to vector<8x1xf32>
    %59 = tpu.reciprocal %58 {approx = true} : vector<8x1xf32> -> vector<8x1xf32>
    %60 = vector.broadcast %59 : vector<8x1xf32> to vector<8x16xf32>
    %61 = arith.mulf %56, %60 : vector<8x16xf32>
    %62 = arith.truncf %61 : vector<8x16xf32> to vector<8x16xbf16>
    %cst_23 = arith.constant dense<0.000000e+00> : vector<8x8xf32>
    %63 = tpu.matmul %62, %49, %cst_23 {dimension_numbers = #tpu.dot_dimension_numbers<[1], [0], [0], [1], [0, 0, 1, 1], [], []>} : vector<8x16xbf16>, vector<16x8xbf16>, vector<8x8xf32> -> vector<8x8xf32>
    %64 = arith.truncf %63 : vector<8x8xf32> to vector<8x8xbf16>
    %c0_24 = arith.constant 0 : index
    %c0_25 = arith.constant 0 : index
    %65 = vector.load %arg19[%c0_24, %c0_25] : memref<8x32xbf16, #tpu.memory_space<vmem>>, vector<8x8xbf16>
    tpu.vector_store %arg19[%c0_24, %c0_25], %64 {strides = array<i32>} : memref<8x32xbf16, #tpu.memory_space<vmem>>, vector<8x8xbf16>,
    %66 = vector.extract_strided_slice %38 {offsets = [0, 8], sizes = [8, 8], strides = [1, 1]} : vector<8x32xbf16> to vector<8x8xbf16>
    %c0_26 = arith.constant 0 : index
    %c8 = arith.constant 8 : index
    %67 = vector.load %arg18[%c0_26, %c8] : memref<16x64xbf16, #tpu.memory_space<vmem>>, vector<16x8xbf16>
    %c0_27 = arith.constant 0 : index
    %c40 = arith.constant 40 : index
    %68 = vector.load %arg18[%c0_27, %c40] : memref<16x64xbf16, #tpu.memory_space<vmem>>, vector<16x8xbf16>
    %cst_28 = arith.constant dense<0.000000e+00> : vector<8x16xf32>
    %69 = tpu.matmul %66, %67, %cst_28 {dimension_numbers = #tpu.dot_dimension_numbers<[1], [1], [0], [0], [0, 0, 1, 0], [], []>} : vector<8x8xbf16>, vector<16x8xbf16>, vector<8x16xf32> -> vector<8x16xf32>
    %70 = arith.addf %69, %46 : vector<8x16xf32>
    %cst_29 = arith.constant dense<0xFF800000> : vector<8xf32>
    %71 = vector.multi_reduction <maximumf>, %70, %cst_29 [1] : vector<8x16xf32> to vector<8xf32>
    %72 = vector.shape_cast %71 : vector<8xf32> to vector<8x1xf32>
    %73 = vector.broadcast %72 : vector<8x1xf32> to vector<8x16xf32>
    %74 = arith.subf %70, %73 : vector<8x16xf32>
    %75 = math.exp %74 : vector<8x16xf32>
    %cst_30 = arith.constant dense<0.000000e+00> : vector<8xf32>
    %76 = vector.multi_reduction <add>, %75, %cst_30 [1] : vector<8x16xf32> to vector<8xf32>
    %77 = vector.shape_cast %76 : vector<8xf32> to vector<8x1xf32>
    %78 = tpu.reciprocal %77 {approx = true} : vector<8x1xf32> -> vector<8x1xf32>
    %79 = vector.broadcast %78 : vector<8x1xf32> to vector<8x16xf32>
    %80 = arith.mulf %75, %79 : vector<8x16xf32>
    %81 = arith.truncf %80 : vector<8x16xf32> to vector<8x16xbf16>
    %cst_31 = arith.constant dense<0.000000e+00> : vector<8x8xf32>
    %82 = tpu.matmul %81, %68, %cst_31 {dimension_numbers = #tpu.dot_dimension_numbers<[1], [0], [0], [1], [0, 0, 1, 1], [], []>} : vector<8x16xbf16>, vector<16x8xbf16>, vector<8x8xf32> -> vector<8x8xf32>
    %83 = arith.truncf %82 : vector<8x8xf32> to vector<8x8xbf16>
    %c0_32 = arith.constant 0 : index
    %c8_33 = arith.constant 8 : index
    %84 = vector.load %arg19[%c0_32, %c8_33] : memref<8x32xbf16, #tpu.memory_space<vmem>>, vector<8x8xbf16>
    tpu.vector_store %arg19[%c0_32, %c8_33], %83 {strides = array<i32>} : memref<8x32xbf16, #tpu.memory_space<vmem>>, vector<8x8xbf16>,
    %85 = vector.extract_strided_slice %38 {offsets = [0, 16], sizes = [8, 8], strides = [1, 1]} : vector<8x32xbf16> to vector<8x8xbf16>
    %c0_34 = arith.constant 0 : index
    %c16 = arith.constant 16 : index
    %86 = vector.load %arg18[%c0_34, %c16] : memref<16x64xbf16, #tpu.memory_space<vmem>>, vector<16x8xbf16>
    %c0_35 = arith.constant 0 : index
    %c48 = arith.constant 48 : index
    %87 = vector.load %arg18[%c0_35, %c48] : memref<16x64xbf16, #tpu.memory_space<vmem>>, vector<16x8xbf16>
    %cst_36 = arith.constant dense<0.000000e+00> : vector<8x16xf32>
    %88 = tpu.matmul %85, %86, %cst_36 {dimension_numbers = #tpu.dot_dimension_numbers<[1], [1], [0], [0], [0, 0, 1, 0], [], []>} : vector<8x8xbf16>, vector<16x8xbf16>, vector<8x16xf32> -> vector<8x16xf32>
    %89 = arith.addf %88, %46 : vector<8x16xf32>
    %cst_37 = arith.constant dense<0xFF800000> : vector<8xf32>
    %90 = vector.multi_reduction <maximumf>, %89, %cst_37 [1] : vector<8x16xf32> to vector<8xf32>
    %91 = vector.shape_cast %90 : vector<8xf32> to vector<8x1xf32>
    %92 = vector.broadcast %91 : vector<8x1xf32> to vector<8x16xf32>
    %93 = arith.subf %89, %92 : vector<8x16xf32>
    %94 = math.exp %93 : vector<8x16xf32>
    %cst_38 = arith.constant dense<0.000000e+00> : vector<8xf32>
    %95 = vector.multi_reduction <add>, %94, %cst_38 [1] : vector<8x16xf32> to vector<8xf32>
    %96 = vector.shape_cast %95 : vector<8xf32> to vector<8x1xf32>
    %97 = tpu.reciprocal %96 {approx = true} : vector<8x1xf32> -> vector<8x1xf32>
    %98 = vector.broadcast %97 : vector<8x1xf32> to vector<8x16xf32>
    %99 = arith.mulf %94, %98 : vector<8x16xf32>
    %100 = arith.truncf %99 : vector<8x16xf32> to vector<8x16xbf16>
    %cst_39 = arith.constant dense<0.000000e+00> : vector<8x8xf32>
    %101 = tpu.matmul %100, %87, %cst_39 {dimension_numbers = #tpu.dot_dimension_numbers<[1], [0], [0], [1], [0, 0, 1, 1], [], []>} : vector<8x16xbf16>, vector<16x8xbf16>, vector<8x8xf32> -> vector<8x8xf32>
    %102 = arith.truncf %101 : vector<8x8xf32> to vector<8x8xbf16>
    %c0_40 = arith.constant 0 : index
    %c16_41 = arith.constant 16 : index
    %103 = vector.load %arg19[%c0_40, %c16_41] : memref<8x32xbf16, #tpu.memory_space<vmem>>, vector<8x8xbf16>
    tpu.vector_store %arg19[%c0_40, %c16_41], %102 {strides = array<i32>} : memref<8x32xbf16, #tpu.memory_space<vmem>>, vector<8x8xbf16>,
    %104 = vector.extract_strided_slice %38 {offsets = [0, 24], sizes = [8, 8], strides = [1, 1]} : vector<8x32xbf16> to vector<8x8xbf16>
    %c0_42 = arith.constant 0 : index
    %c24 = arith.constant 24 : index
    %105 = vector.load %arg18[%c0_42, %c24] : memref<16x64xbf16, #tpu.memory_space<vmem>>, vector<16x8xbf16>
    %c0_43 = arith.constant 0 : index
    %c56 = arith.constant 56 : index
    %106 = vector.load %arg18[%c0_43, %c56] : memref<16x64xbf16, #tpu.memory_space<vmem>>, vector<16x8xbf16>
    %cst_44 = arith.constant dense<0.000000e+00> : vector<8x16xf32>
    %107 = tpu.matmul %104, %105, %cst_44 {dimension_numbers = #tpu.dot_dimension_numbers<[1], [1], [0], [0], [0, 0, 1, 0], [], []>} : vector<8x8xbf16>, vector<16x8xbf16>, vector<8x16xf32> -> vector<8x16xf32>
    %108 = arith.addf %107, %46 : vector<8x16xf32>
    %cst_45 = arith.constant dense<0xFF800000> : vector<8xf32>
    %109 = vector.multi_reduction <maximumf>, %108, %cst_45 [1] : vector<8x16xf32> to vector<8xf32>
    %110 = vector.shape_cast %109 : vector<8xf32> to vector<8x1xf32>
    %111 = vector.broadcast %110 : vector<8x1xf32> to vector<8x16xf32>
    %112 = arith.subf %108, %111 : vector<8x16xf32>
    %113 = math.exp %112 : vector<8x16xf32>
    %cst_46 = arith.constant dense<0.000000e+00> : vector<8xf32>
    %114 = vector.multi_reduction <add>, %113, %cst_46 [1] : vector<8x16xf32> to vector<8xf32>
    %115 = vector.shape_cast %114 : vector<8xf32> to vector<8x1xf32>
    %116 = tpu.reciprocal %115 {approx = true} : vector<8x1xf32> -> vector<8x1xf32>
    %117 = vector.broadcast %116 : vector<8x1xf32> to vector<8x16xf32>
    %118 = arith.mulf %113, %117 : vector<8x16xf32>
    %119 = arith.truncf %118 : vector<8x16xf32> to vector<8x16xbf16>
    %cst_47 = arith.constant dense<0.000000e+00> : vector<8x8xf32>
    %120 = tpu.matmul %119, %106, %cst_47 {dimension_numbers = #tpu.dot_dimension_numbers<[1], [0], [0], [1], [0, 0, 1, 1], [], []>} : vector<8x16xbf16>, vector<16x8xbf16>, vector<8x8xf32> -> vector<8x8xf32>
    %121 = arith.truncf %120 : vector<8x8xf32> to vector<8x8xbf16>
    %c0_48 = arith.constant 0 : index
    %c24_49 = arith.constant 24 : index
    %122 = vector.load %arg19[%c0_48, %c24_49] : memref<8x32xbf16, #tpu.memory_space<vmem>>, vector<8x8xbf16>
    tpu.vector_store %arg19[%c0_48, %c24_49], %121 {strides = array<i32>} : memref<8x32xbf16, #tpu.memory_space<vmem>>, vector<8x8xbf16>,
    %c0_50 = arith.constant 0 : index
    %c0_51 = arith.constant 0 : index
    %123 = vector.load %arg19[%c0_50, %c0_51] : memref<8x32xbf16, #tpu.memory_space<vmem>>, vector<8x32xbf16>
    %c0_52 = arith.constant 0 : index
    %c0_53 = arith.constant 0 : index
    %124 = vector.load %arg9[%c0_52, %c0_53] : memref<32x32xbf16, #tpu.memory_space<vmem>>, vector<32x32xbf16>
    %cst_54 = arith.constant dense<0.000000e+00> : vector<8x32xf32>
    %125 = tpu.matmul %123, %124, %cst_54 {dimension_numbers = #tpu.dot_dimension_numbers<[1], [0], [0], [1], [0, 0, 1, 1], [], []>} : vector<8x32xbf16>, vector<32x32xbf16>, vector<8x32xf32> -> vector<8x32xf32>
    %c0_55 = arith.constant 0 : index
    %c0_56 = arith.constant 0 : index
    %126 = vector.load %arg10[%c0_55, %c0_56] : memref<1x32xf32, #tpu.memory_space<vmem>>, vector<1x32xf32>
    %127 = vector.broadcast %126 : vector<1x32xf32> to vector<8x32xf32>
    %128 = arith.addf %125, %127 : vector<8x32xf32>
    %129 = arith.addf %7, %128 : vector<8x32xf32>
    %c0_57 = arith.constant 0 : index
    %c0_58 = arith.constant 0 : index
    %130 = vector.load %arg11[%c0_57, %c0_58] : memref<1x32xf32, #tpu.memory_space<vmem>>, vector<1x32xf32>
    %c0_59 = arith.constant 0 : index
    %c0_60 = arith.constant 0 : index
    %131 = vector.load %arg12[%c0_59, %c0_60] : memref<1x32xf32, #tpu.memory_space<vmem>>, vector<1x32xf32>
    %cst_61 = arith.constant dense<0.000000e+00> : vector<8xf32>
    %132 = vector.multi_reduction <add>, %129, %cst_61 [1] : vector<8x32xf32> to vector<8xf32>
    %133 = vector.shape_cast %132 : vector<8xf32> to vector<8x1xf32>
    %cst_62 = arith.constant 3.200000e+01 : f32
    %134 = vector.broadcast %cst_62 : f32 to vector<8x1xf32>
    %135 = arith.divf %133, %134 : vector<8x1xf32>
    %136 = vector.broadcast %135 : vector<8x1xf32> to vector<8x32xf32>
    %137 = arith.subf %129, %136 : vector<8x32xf32>
    %138 = arith.mulf %137, %137 : vector<8x32xf32>
    %cst_63 = arith.constant dense<0.000000e+00> : vector<8xf32>
    %139 = vector.multi_reduction <add>, %138, %cst_63 [1] : vector<8x32xf32> to vector<8xf32>
    %140 = vector.shape_cast %139 : vector<8xf32> to vector<8x1xf32>
    %cst_64 = arith.constant 3.200000e+01 : f32
    %141 = vector.broadcast %cst_64 : f32 to vector<8x1xf32>
    %142 = arith.divf %140, %141 : vector<8x1xf32>
    %143 = vector.broadcast %135 : vector<8x1xf32> to vector<8x32xf32>
    %144 = arith.subf %129, %143 : vector<8x32xf32>
    %cst_65 = arith.constant 9.99999974E-6 : f32
    %145 = vector.broadcast %cst_65 : f32 to vector<8x1xf32>
    %146 = arith.addf %142, %145 : vector<8x1xf32>
    %147 = math.rsqrt %146 : vector<8x1xf32>
    %148 = vector.broadcast %147 : vector<8x1xf32> to vector<8x32xf32>
    %149 = arith.mulf %144, %148 : vector<8x32xf32>
    %150 = vector.broadcast %130 : vector<1x32xf32> to vector<8x32xf32>
    %151 = arith.mulf %149, %150 : vector<8x32xf32>
    %152 = vector.broadcast %131 : vector<1x32xf32> to vector<8x32xf32>
    %153 = arith.addf %151, %152 : vector<8x32xf32>
    %154 = arith.truncf %153 : vector<8x32xf32> to vector<8x32xbf16>
    %c0_66 = arith.constant 0 : index
    %c0_67 = arith.constant 0 : index
    %155 = vector.load %arg13[%c0_66, %c0_67] : memref<32x64xbf16, #tpu.memory_space<vmem>>, vector<32x64xbf16>
    %cst_68 = arith.constant dense<0.000000e+00> : vector<8x64xf32>
    %156 = tpu.matmul %154, %155, %cst_68 {dimension_numbers = #tpu.dot_dimension_numbers<[1], [0], [0], [1], [0, 0, 1, 1], [], []>} : vector<8x32xbf16>, vector<32x64xbf16>, vector<8x64xf32> -> vector<8x64xf32>
    %c0_69 = arith.constant 0 : index
    %c0_70 = arith.constant 0 : index
    %157 = vector.load %arg14[%c0_69, %c0_70] : memref<1x64xf32, #tpu.memory_space<vmem>>, vector<1x64xf32>
    %158 = vector.broadcast %157 : vector<1x64xf32> to vector<8x64xf32>
    %159 = arith.addf %156, %158 : vector<8x64xf32>
    %cst_71 = arith.constant 0.000000e+00 : f32
    %160 = vector.broadcast %cst_71 : f32 to vector<8x64xf32>
    %161 = arith.maximumf %159, %160 : vector<8x64xf32>
    %162 = arith.truncf %161 : vector<8x64xf32> to vector<8x64xbf16>
    %c0_72 = arith.constant 0 : index
    %c0_73 = arith.constant 0 : index
    %163 = vector.load %arg15[%c0_72, %c0_73] : memref<64x32xbf16, #tpu.memory_space<vmem>>, vector<64x32xbf16>
    %cst_74 = arith.constant dense<0.000000e+00> : vector<8x32xf32>
    %164 = tpu.matmul %162, %163, %cst_74 {dimension_numbers = #tpu.dot_dimension_numbers<[1], [0], [0], [1], [0, 0, 1, 1], [], []>} : vector<8x64xbf16>, vector<64x32xbf16>, vector<8x32xf32> -> vector<8x32xf32>
    %c0_75 = arith.constant 0 : index
    %c0_76 = arith.constant 0 : index
    %165 = vector.load %arg16[%c0_75, %c0_76] : memref<1x32xf32, #tpu.memory_space<vmem>>, vector<1x32xf32>
    %166 = vector.broadcast %165 : vector<1x32xf32> to vector<8x32xf32>
    %167 = arith.addf %164, %166 : vector<8x32xf32>
    %168 = arith.addf %129, %167 : vector<8x32xf32>
    %c0_77 = arith.constant 0 : index
    %c0_78 = arith.constant 0 : index
    %c0_79 = arith.constant 0 : index
    %169 = vector.load %arg17[%c0_77, %c0_78, %c0_79] : memref<1x8x32xf32, #tpu.memory_space<vmem>>, vector<1x8x32xf32>
    %170 = vector.shape_cast %169 : vector<1x8x32xf32> to vector<8x32xf32>
    %171 = vector.shape_cast %168 : vector<8x32xf32> to vector<1x8x32xf32>
    tpu.vector_store %arg17[%c0_77, %c0_78, %c0_79], %171 {strides = array<i32>} : memref<1x8x32xf32, #tpu.memory_space<vmem>>, vector<1x8x32xf32>,
    return
  }
  func.func @transform_0(%arg0: i32, %arg1: i32) -> (i32, i32, i32) {
    %c0_i32 = arith.constant 0 : i32
    %c0_i32_0 = arith.constant 0 : i32
    %c0_i32_1 = arith.constant 0 : i32
    return %arg0, %c0_i32, %c0_i32_0 : i32, i32, i32
  }
  func.func @transform_1(%arg0: i32, %arg1: i32) -> (i32, i32) {
    %c0_i32 = arith.constant 0 : i32
    %c0_i32_0 = arith.constant 0 : i32
    %c0_i32_1 = arith.constant 0 : i32
    return %c0_i32, %c0_i32_0 : i32, i32
  }
  func.func @transform_2(%arg0: i32, %arg1: i32) -> (i32, i32) {
    %c0_i32 = arith.constant 0 : i32
    %c0_i32_0 = arith.constant 0 : i32
    %c0_i32_1 = arith.constant 0 : i32
    return %c0_i32, %c0_i32_0 : i32, i32
  }
  func.func @transform_3(%arg0: i32, %arg1: i32) -> (i32, i32) {
    %c0_i32 = arith.constant 0 : i32
    %c0_i32_0 = arith.constant 0 : i32
    %c0_i32_1 = arith.constant 0 : i32
    return %c0_i32, %c0_i32_0 : i32, i32
  }
  func.func @transform_4(%arg0: i32, %arg1: i32) -> (i32, i32) {
    %c0_i32 = arith.constant 0 : i32
    %c0_i32_0 = arith.constant 0 : i32
    %c0_i32_1 = arith.constant 0 : i32
    return %c0_i32, %c0_i32_0 : i32, i32
  }
  func.func @transform_5(%arg0: i32, %arg1: i32) -> (i32, i32) {
    %c0_i32 = arith.constant 0 : i32
    %c0_i32_0 = arith.constant 0 : i32
    %c0_i32_1 = arith.constant 0 : i32
    return %c0_i32, %c0_i32_0 : i32, i32
  }
  func.func @transform_6(%arg0: i32, %arg1: i32) -> (i32, i32) {
    %c0_i32 = arith.constant 0 : i32
    %c0_i32_0 = arith.constant 0 : i32
    %c0_i32_1 = arith.constant 0 : i32
    return %c0_i32, %c0_i32_0 : i32, i32
  }
  func.func @transform_7(%arg0: i32, %arg1: i32) -> (i32, i32) {
    %c0_i32 = arith.constant 0 : i32
    %c0_i32_0 = arith.constant 0 : i32
    %c0_i32_1 = arith.constant 0 : i32
    return %c0_i32, %c0_i32_0 : i32, i32
  }
  func.func @transform_8(%arg0: i32, %arg1: i32) -> (i32, i32) {
    %c0_i32 = arith.constant 0 : i32
    %c0_i32_0 = arith.constant 0 : i32
    %c0_i32_1 = arith.constant 0 : i32
    return %c0_i32, %c0_i32_0 : i32, i32
  }
  func.func @transform_9(%arg0: i32, %arg1: i32) -> (i32, i32) {
    %c0_i32 = arith.constant 0 : i32
    %c0_i32_0 = arith.constant 0 : i32
    %c0_i32_1 = arith.constant 0 : i32
    return %c0_i32, %c0_i32_0 : i32, i32
  }
  func.func @transform_10(%arg0: i32, %arg1: i32) -> (i32, i32) {
    %c0_i32 = arith.constant 0 : i32
    %c0_i32_0 = arith.constant 0 : i32
    %c0_i32_1 = arith.constant 0 : i32
    return %c0_i32, %c0_i32_0 : i32, i32
  }
  func.func @transform_11(%arg0: i32, %arg1: i32) -> (i32, i32) {
    %c0_i32 = arith.constant 0 : i32
    %c0_i32_0 = arith.constant 0 : i32
    %c0_i32_1 = arith.constant 0 : i32
    return %c0_i32, %c0_i32_0 : i32, i32
  }
  func.func @transform_12(%arg0: i32, %arg1: i32) -> (i32, i32) {
    %c0_i32 = arith.constant 0 : i32
    %c0_i32_0 = arith.constant 0 : i32
    %c0_i32_1 = arith.constant 0 : i32
    return %c0_i32, %c0_i32_0 : i32, i32
  }
  func.func @transform_13(%arg0: i32, %arg1: i32) -> (i32, i32) {
    %c0_i32 = arith.constant 0 : i32
    %c0_i32_0 = arith.constant 0 : i32
    %c0_i32_1 = arith.constant 0 : i32
    return %c0_i32, %c0_i32_0 : i32, i32
  }
  func.func @transform_14(%arg0: i32, %arg1: i32) -> (i32, i32) {
    %c0_i32 = arith.constant 0 : i32
    %c0_i32_0 = arith.constant 0 : i32
    %c0_i32_1 = arith.constant 0 : i32
    return %c0_i32, %c0_i32_0 : i32, i32
  }
  func.func @transform_15(%arg0: i32, %arg1: i32) -> (i32, i32, i32) {
    %c0_i32 = arith.constant 0 : i32
    %c0_i32_0 = arith.constant 0 : i32
    return %arg0, %arg1, %c0_i32 : i32, i32, i32
  }
}

</mosaic_0001>

<bundles_post_ra>
// kernel: tpu_custom_call.1
= control target key start
LH: loop header
LB: loop body
LE: loop exit
PB: predicated region body
PF: predicated region fallthrough
CT: control target
= control target key end

     0   :  { %s3767_s0 = inlined_call_operand.hbm [shape: f32[2,16,32], index: 0, kind: input, shape index: {}]   ;;  %s3768_s1 = inlined_call_operand.hbm [shape: f32[1,32], index: 1, kind: input, shape index: {}]   ;;  %s3769_s2 = inlined_call_operand.hbm [shape: f32[1,32], index: 2, kind: input, shape index: {}]   ;;  %s3770_s3 = inlined_call_operand.hbm [shape: bf16[32,32], index: 3, kind: input, shape index: {}]   ;;  %s3771_s4 = inlined_call_operand.hbm [shape: f32[1,32], index: 4, kind: input, shape index: {}]   ;;  %s3772_s5 = inlined_call_operand.hbm [shape: bf16[32,64], index: 5, kind: input, shape index: {}]   ;;  %s3773_s6 = inlined_call_operand.hbm [shape: f32[1,64], index: 6, kind: input, shape index: {}]   ;;  %s3774_s7 = inlined_call_operand.hbm [shape: bf16[32,32], index: 7, kind: input, shape index: {}]   ;;  %s3775_s8 = inlined_call_operand.hbm [shape: f32[1,32], index: 8, kind: input, shape index: {}]   ;;  %s3776_s9 = inlined_call_operand.hbm [shape: f32[1,32], index: 9, kind: input, shape index: {}]   ;;  %s3777_s10 = inlined_call_operand.hbm [shape: f32[1,32], index: 10, kind: input, shape index: {}]   ;;  %s3778_s11 = inlined_call_operand.hbm [shape: bf16[32,64], index: 11, kind: input, shape index: {}]   ;;  %s3779_s12 = inlined_call_operand.hbm [shape: f32[1,64], index: 12, kind: input, shape index: {}]   ;;  %s3780_s13 = inlined_call_operand.hbm [shape: bf16[64,32], index: 13, kind: input, shape index: {}]   ;;  %s3781_s14 = inlined_call_operand.hbm [shape: f32[1,32], index: 14, kind: input, shape index: {}]   ;;  %s3782_s15 = inlined_call_operand.hbm [shape: f32[2,16,32], index: 15, kind: output, shape index: {}]  }
   0x1   :  { %3800 = sst [smem:[#allocation49_spill]] %s3767_s0 }
   0x2   :  { %3801 = sst [smem:[#allocation50_spill]] %s3768_s1 }
   0x3   :  { %3802 = sst [smem:[#allocation51_spill]] %s3769_s2 }
   0x4   :  { %3803 = sst [smem:[#allocation52_spill]] %s3770_s3 }
   0x5   :  { %3804 = sst [smem:[#allocation53_spill]] %s3771_s4 }
   0x6   :  { %3805 = sst [smem:[#allocation54_spill]] %s3772_s5 }
   0x7   :  { %3806 = sst [smem:[#allocation55_spill]] %s3773_s6 }
   0x8   :  { %3807 = sst [smem:[#allocation56_spill]] %s3774_s7 }
   0x9   :  { %3808 = sst [smem:[#allocation57_spill]] %s3775_s8 }
   0xa   :  { %3809 = sst [smem:[#allocation58_spill]] %s3782_s15 }
   0xb   :  { %20 = vsyncpa [#allocation5], 0 }
   0xc   :  { %22 = vsyncpa [#allocation5 + $0x1], 0 }
   0xd   :  { %23 = vsyncpa [#allocation8], 0 }
   0xe   :  { %24 = vsyncpa [#allocation11], 0 }
   0xf   :  { %25 = vsyncpa [#allocation14], 0 }
  0x10   :  { %26 = vsyncpa [#allocation17], 0 }
  0x11   :  { %27 = vsyncpa [#allocation20], 0 }
  0x12   :  { %28 = vsyncpa [#allocation23], 0 }
  0x13   :  { %29 = vsyncpa [#allocation26], 0 }
  0x14   :  { %30 = vsyncpa [#allocation6], 0 }
  0x15   :  { %32 = vsyncpa [#allocation6 + $0x1], 0  ;;  %s3100_s18 = smov 0   ;;  %s3102_s19 = smov 0  }
  0x16   :  { %s3104_s20 = smov 0   ;;  %s3106_s21 = smov 0  }
  0x17   :  { %s3108_s22 = smov 0   ;;  %s3110_s23 = smov 0  }
  0x18   :  { %s3112_s24 = smov 0   ;;  %s3114_s25 = smov 0  }
  0x19   :  { %s3116_s26 = smov 0   ;;  %s3118_s27 = smov 0  }
  0x1a   :  { %s3120_s28 = smov 0  }
  0x1b LB: > { %3810 = sst [smem:[#allocation38_spill]] %s2943_s18  ;;  %s3785_s29 = sadd.s32 4294967295, %s2983_s28   ;;  %s2983_s28 = sphi %s3120_s28, %s38_s28   ;;  %s2979_s27 = sphi %s3118_s27, %s3873_s27   ;;  %s2975_s26 = sphi %s3116_s26, %s3872_s26   ;;  %s2971_s25 = sphi %s3114_s25, %s3868_s25   ;;  %s2967_s24 = sphi %s3112_s24, %s3871_s24   ;;  %s2963_s23 = sphi %s3110_s23, %s3870_s23   ;;  %s2959_s22 = sphi %s3108_s22, %s3867_s22   ;;  %s2955_s21 = sphi %s3106_s21, %s3866_s21   ;;  %s2951_s20 = sphi %s3104_s20, %s3869_s20   ;;  %s2947_s19 = sphi %s3102_s19, %s3865_s19   ;;  %s2943_s18 = sphi %s3100_s18, %s3864_s18  }
  0x1c   : > { %3811 = sst [smem:[#allocation39_spill]] %s2947_s19  ;;  %p1902_p0 = scmp.ge.s32.totalorder %s2983_s28, 1 }
  0x1d   : > { %3812 = sst [smem:[#allocation40_spill]] %s2951_s20  ;;  %p3159_p1 = scmp.eq.s32.totalorder %s3785_s29, 0 }
  0x1e   : > { %3813 = sst [smem:[#allocation41_spill]] %s2955_s21  ;;  %p403_p2 = scmp.lt.s32.totalorder %s2983_s28, 5 }
  0x1f   : > { %3814 = sst [smem:[#allocation42_spill]] %s2959_s22  ;;  %s2985_s17 = smov [#allocation7]  }
  0x20   : > { %3815 = sst [smem:[#allocation43_spill]] %s2963_s23  ;;  %p3164_p3 = pnand %p1902_p0, %p403_p2 }
  0x21   : > { %3816 = sst [smem:[#allocation44_spill]] %s2967_s24  ;;  %s416_s15 = sshll.u32 %s2985_s17, 4  ;;  %s417_s15 = int_to_ptr.vmem [resolvable:$true] %s416_s15 }
  0x22   : > { %3817 = sst [smem:[#allocation45_spill]] %s2971_s25  ;;  %p2173_p4 = pneg %p3164_p3 }
  0x23   : > { %3818 = sst [smem:[#allocation46_spill]] %s2979_s27  ;;  %s2986_s25 = smov [#allocation10]  }
  0x24   : > { %s3819_s30 = scalar_select %p3159_p1, 1, 0 }
  0x25   : > { %s3821_s16 = scalar_select %p3164_p3, 1, 0 }
  0x26   : > { %3820 = sst [smem:[#allocation47_spill]] %s3819_s30  ;;  %s437_s24 = sshll.u32 %s2986_s25, 4  ;;  %s3176_s24 = int_to_ptr.vmem [resolvable:$true] %s437_s24 }
  0x27   : > { %3822 = sst [smem:[#allocation48_spill]] %s3821_s16  ;;  %p3172_p5 = pnand %p2173_p4, %p3159_p1 }
  0x28   : > { %s2987_s0 = smov [#allocation13]   ;;  %s3824_s1 = sld [smem:[#allocation50_spill]] }
  0x29   : > { %s3178_s18 = sshll.u32 %s2987_s0, 4  ;;  %p3188_p7 = pneg %p3172_p5  ;;  %s462_s18 = int_to_ptr.vmem [resolvable:$true] %s3178_s18 }
  0x2e   : > { %s2411_s17 = scalar_lea.hbm %s3824_s1, 16 }
  0x2f   : > { %p2412_p6 = scmp.ne.s32.totalorder %s3824_s1, %s2411_s17  ;;  %p2418_p10 = scmp.lt.u32.totalorder %s2411_s17, %s3824_s1 }
  0x31   : > { %p2414_p8 = pnand %p3188_p7, %p2412_p6 }
  0x33   : > { %p2415_p9 = pneg %p2414_p8 }
  0x35   : > { %p2420_p11 = pnand %p2418_p10, %p2415_p9 }
  0x37   : > { %2423 = shalt.err (!%p2420_p11)
}
  0x38   : > { %s2424_s19 = scalar_lea.vmem %s417_s15, 16  ;;  %s2431_s20 = scalar_lea.vmem %s417_s15, 32 }
  0x39   : > { %p2425_p12 = scmp.ne.s32.totalorder %s417_s15, %s2424_s19  ;;  %p2432_p2 = scmp.lt.s32.totalorder %s417_s15, %s417_s15 }
  0x3a   : > { %p2433_p4 = scmp.lt.s32.totalorder %s2431_s20, %s2424_s19 }
  0x3b   : > { %p2427_p13 = pnand %p2425_p12, %p3188_p7 }
  0x3c   : > { %p2434_p3 = por %p2433_p4, %p2432_p2 }
  0x3d   : > { %p2428_p0 = pneg %p2427_p13 }
  0x3f   : > { %p2435_p1 = pnand %p2434_p3, %p2428_p0 }
  0x41   : > { %2438 = shalt.err (!%p2435_p1)
}
  0x42   : > { %2176 = dma.hbm_to_vmem [thread:$0]  (!%p3172_p5), %s3824_s1, 16, %s417_s15, [#allocation8]  }
  0x43   : > { %s3826_s3 = sld [smem:[#allocation52_spill]] }
  0x49   : > { %s2439_s0 = scalar_lea.hbm %s3826_s3, 256 }
  0x4a   : > { %p2440_p6 = scmp.ne.s32.totalorder %s3826_s3, %s2439_s0  ;;  %p2446_p1 = scmp.lt.u32.totalorder %s2439_s0, %s3826_s3 }
  0x4c   : > { %p2442_p8 = pnand %p2440_p6, %p3188_p7 }
  0x4e   : > { %p2443_p9 = pneg %p2442_p8 }
  0x50   : > { %p2448_p3 = pnand %p2446_p1, %p2443_p9 }
  0x52   : > { %2451 = shalt.err (!%p2448_p3)
}
  0x53   : > { %s2452_s15 = scalar_lea.vmem %s3176_s24, 256  ;;  %p2460_p13 = scmp.lt.s32.totalorder %s3176_s24, %s3176_s24 }
  0x54   : > { %p2453_p10 = scmp.ne.s32.totalorder %s3176_s24, %s2452_s15  ;;  %p2461_p0 = scmp.lt.s32.totalorder %s2452_s15, %s2452_s15 }
  0x56   : > { %p2455_p11 = pnand %p2453_p10, %p3188_p7  ;;  %p2462_p2 = por %p2461_p0, %p2460_p13 }
  0x58   : > { %p2456_p12 = pneg %p2455_p11 }
  0x5a   : > { %p2463_p4 = pnand %p2462_p2, %p2456_p12 }
  0x5c   : > { %2466 = shalt.err (!%p2463_p4)
}
  0x5d   : > { %s2988_s22 = smov 64   ;;  %s2989_s23 = smov 4  }
  0x5e   : > { %2182 = dma.hbm_to_vmem [thread:$0]  (!%p3172_p5), %s3826_s3, 256, %s3176_s24, [#allocation11], %s2988_s22, %s2988_s22, %s2989_s23  }
  0x5f   : > { %s3827_s5 = sld [smem:[#allocation54_spill]] }
  0x65   : > { %s2467_s0 = scalar_lea.hbm %s3827_s5, 256 }
  0x66   : > { %p2468_p6 = scmp.ne.s32.totalorder %s3827_s5, %s2467_s0  ;;  %p2474_p1 = scmp.lt.u32.totalorder %s2467_s0, %s3827_s5 }
  0x68   : > { %p2470_p8 = pnand %p2468_p6, %p3188_p7 }
  0x6a   : > { %p2471_p9 = pneg %p2470_p8 }
  0x6c   : > { %p2476_p3 = pnand %p2474_p1, %p2471_p9 }
  0x6e   : > { %2479 = shalt.err (!%p2476_p3)
}
  0x6f   : > { %s2480_s21 = scalar_lea.vmem %s462_s18, 256  ;;  %p2488_p13 = scmp.lt.s32.totalorder %s462_s18, %s462_s18 }
  0x70   : > { %p2481_p10 = scmp.ne.s32.totalorder %s462_s18, %s2480_s21  ;;  %p2489_p0 = scmp.lt.s32.totalorder %s2480_s21, %s2480_s21 }
  0x72   : > { %p2483_p11 = pnand %p2481_p10, %p3188_p7  ;;  %p2490_p2 = por %p2489_p0, %p2488_p13 }
  0x74   : > { %p2484_p12 = pneg %p2483_p11 }
  0x76   : > { %p2491_p4 = pnand %p2490_p2, %p2484_p12 }
  0x78   : > { %2494 = shalt.err (!%p2491_p4)
}
  0x79   : > { %2188 = dma.hbm_to_vmem [thread:$0]  (!%p3172_p5), %s3827_s5, 256, %s462_s18, [#allocation14], %s2988_s22, %s2988_s22, %s2989_s23  }
  0x7a   : > { %s2990_s16 = smov [#allocation16]   ;;  %s2991_s17 = smov [#allocation19]  }
  0x7b   : > { %s485_s30 = sshll.u32 %s2990_s16, 4  ;;  %s510_s0 = sshll.u32 %s2991_s17, 4  ;;  %s486_s30 = int_to_ptr.vmem [resolvable:$true] %s485_s30  ;;  %s511_s0 = int_to_ptr.vmem [resolvable:$true] %s510_s0 }
  0x7c   : > { %s3828_s7 = sld [smem:[#allocation56_spill]] }
  0x82   : > { %s2495_s15 = scalar_lea.hbm %s3828_s7, 256 }
  0x83   : > { %p2496_p6 = scmp.ne.s32.totalorder %s3828_s7, %s2495_s15  ;;  %p2502_p1 = scmp.lt.u32.totalorder %s2495_s15, %s3828_s7 }
  0x85   : > { %p2498_p8 = pnand %p2496_p6, %p3188_p7 }
  0x87   : > { %p2499_p9 = pneg %p2498_p8 }
  0x89   : > { %p2504_p3 = pnand %p2502_p1, %p2499_p9 }
  0x8b   : > { %2507 = shalt.err (!%p2504_p3)
}
  0x8c   : > { %s2508_s18 = scalar_lea.vmem %s486_s30, 256  ;;  %p2516_p13 = scmp.lt.s32.totalorder %s486_s30, %s486_s30 }
  0x8d   : > { %p2509_p10 = scmp.ne.s32.totalorder %s486_s30, %s2508_s18  ;;  %p2517_p0 = scmp.lt.s32.totalorder %s2508_s18, %s2508_s18 }
  0x8f   : > { %p2511_p11 = pnand %p2509_p10, %p3188_p7  ;;  %p2518_p2 = por %p2517_p0, %p2516_p13 }
  0x91   : > { %p2512_p12 = pneg %p2511_p11 }
  0x93   : > { %p2519_p4 = pnand %p2518_p2, %p2512_p12 }
  0x95   : > { %2522 = shalt.err (!%p2519_p4)
}
  0x96   : > { %2194 = dma.hbm_to_vmem [thread:$0]  (!%p3172_p5), %s3828_s7, 256, %s486_s30, [#allocation17], %s2988_s22, %s2988_s22, %s2989_s23  }
  0x97   : > { %s2523_s17 = scalar_lea.hbm %s3776_s9, 16 }
  0x98   : > { %p2524_p6 = scmp.ne.s32.totalorder %s3776_s9, %s2523_s17  ;;  %p2530_p1 = scmp.lt.u32.totalorder %s2523_s17, %s3776_s9 }
  0x9a   : > { %p2526_p8 = pnand %p2524_p6, %p3188_p7 }
  0x9c   : > { %p2527_p9 = pneg %p2526_p8 }
  0x9e   : > { %p2532_p3 = pnand %p2530_p1, %p2527_p9 }
  0xa0   : > { %2535 = shalt.err (!%p2532_p3)
}
  0xa1   : > { %s2536_s1 = scalar_lea.vmem %s511_s0, 16  ;;  %s2543_s30 = scalar_lea.vmem %s511_s0, 32 }
  0xa2   : > { %p2537_p10 = scmp.ne.s32.totalorder %s511_s0, %s2536_s1  ;;  %p2544_p13 = scmp.lt.s32.totalorder %s511_s0, %s511_s0 }
  0xa3   : > { %p2545_p0 = scmp.lt.s32.totalorder %s2543_s30, %s2536_s1 }
  0xa4   : > { %p2539_p11 = pnand %p2537_p10, %p3188_p7 }
  0xa5   : > { %p2546_p2 = por %p2545_p0, %p2544_p13 }
  0xa6   : > { %p2540_p12 = pneg %p2539_p11 }
  0xa8   : > { %p2547_p4 = pnand %p2546_p2, %p2540_p12 }
  0xaa   : > { %2550 = shalt.err (!%p2547_p4)
}
  0xab   : > { %2200 = dma.hbm_to_vmem [thread:$0]  (!%p3172_p5), %s3776_s9, 16, %s511_s0, [#allocation20]  }
  0xac   : > { %s2992_s27 = smov [#allocation22]   ;;  %s2993_s16 = smov [#allocation25]  }
  0xad   : > { %s531_s24 = sshll.u32 %s2992_s27, 4  ;;  %s555_s17 = sshll.u32 %s2993_s16, 4  ;;  %s532_s24 = int_to_ptr.vmem [resolvable:$true] %s531_s24  ;;  %s556_s17 = int_to_ptr.vmem [resolvable:$true] %s555_s17 }
  0xae   : > { %s2551_s15 = scalar_lea.hbm %s3778_s11, 256 }
  0xaf   : > { %p2552_p6 = scmp.ne.s32.totalorder %s3778_s11, %s2551_s15  ;;  %p2558_p1 = scmp.lt.u32.totalorder %s2551_s15, %s3778_s11 }
  0xb1   : > { %p2554_p8 = pnand %p2552_p6, %p3188_p7 }
  0xb3   : > { %p2555_p9 = pneg %p2554_p8 }
  0xb5   : > { %p2560_p3 = pnand %p2558_p1, %p2555_p9 }
  0xb7   : > { %2563 = shalt.err (!%p2560_p3)
}
  0xb8   : > { %s2564_s0 = scalar_lea.vmem %s532_s24, 256  ;;  %p2572_p13 = scmp.lt.s32.totalorder %s532_s24, %s532_s24 }
  0xb9   : > { %p2565_p10 = scmp.ne.s32.totalorder %s532_s24, %s2564_s0  ;;  %p2573_p0 = scmp.lt.s32.totalorder %s2564_s0, %s2564_s0 }
  0xbb   : > { %p2567_p11 = pnand %p2565_p10, %p3188_p7  ;;  %p2574_p2 = por %p2573_p0, %p2572_p13 }
  0xbd   : > { %p2568_p12 = pneg %p2567_p11 }
  0xbf   : > { %p2575_p4 = pnand %p2574_p2, %p2568_p12 }
  0xc1   : > { %2578 = shalt.err (!%p2575_p4)
}
  0xc2   : > { %2206 = dma.hbm_to_vmem [thread:$0]  (!%p3172_p5), %s3778_s11, 256, %s532_s24, [#allocation23], %s2988_s22, %s2988_s22, %s2989_s23  }
  0xc3   : > { %s2579_s20 = scalar_lea.hbm %s3780_s13, 512 }
  0xc4   : > { %p2580_p6 = scmp.ne.s32.totalorder %s3780_s13, %s2579_s20  ;;  %p2586_p1 = scmp.lt.u32.totalorder %s2579_s20, %s3780_s13 }
  0xc6   : > { %p2582_p8 = pnand %p2580_p6, %p3188_p7 }
  0xc8   : > { %p2583_p9 = pneg %p2582_p8 }
  0xca   : > { %p2588_p3 = pnand %p2586_p1, %p2583_p9 }
  0xcc   : > { %2591 = shalt.err (!%p2588_p3)
}
  0xcd   : > { %s2592_s18 = scalar_lea.vmem %s556_s17, 512  ;;  %p2600_p13 = scmp.lt.s32.totalorder %s556_s17, %s556_s17 }
  0xce   : > { %p2593_p10 = scmp.ne.s32.totalorder %s556_s17, %s2592_s18  ;;  %p2601_p0 = scmp.lt.s32.totalorder %s2592_s18, %s2592_s18 }
  0xd0   : > { %p2595_p11 = pnand %p2593_p10, %p3188_p7  ;;  %p2602_p2 = por %p2601_p0, %p2600_p13 }
  0xd2   : > { %p2596_p12 = pneg %p2595_p11 }
  0xd4   : > { %p2603_p4 = pnand %p2602_p2, %p2596_p12 }
  0xd6   : > { %2606 = shalt.err (!%p2603_p4)
}
  0xd7   : > { %2212 = dma.hbm_to_vmem [thread:$0]  (!%p3172_p5), %s3780_s13, 512, %s556_s17, [#allocation26], %s2988_s22, %s2988_s22, %s2989_s23  }
  0xd8   : > { %s2994_s3 = smov [#allocation9]   ;;  %s2995_s16 = smov [#allocation12]  }
  0xd9   : > { %s427_s27 = sshll.u32 %s2994_s3, 4  ;;  %s451_s19 = sshll.u32 %s2995_s16, 4  ;;  %s428_s27 = int_to_ptr.vmem [resolvable:$true] %s427_s27  ;;  %s452_s19 = int_to_ptr.vmem [resolvable:$true] %s451_s19 }
  0xda   : > { %s3829_s2 = sld [smem:[#allocation51_spill]] }
  0xe0   : > { %s2607_s21 = scalar_lea.hbm %s3829_s2, 16 }
  0xe1   : > { %p2608_p6 = scmp.ne.s32.totalorder %s3829_s2, %s2607_s21  ;;  %p2614_p1 = scmp.lt.u32.totalorder %s2607_s21, %s3829_s2 }
  0xe3   : > { %p2610_p8 = pnand %p2608_p6, %p3188_p7 }
  0xe5   : > { %p2611_p9 = pneg %p2610_p8 }
  0xe7   : > { %p2616_p3 = pnand %p2614_p1, %p2611_p9 }
  0xe9   : > { %2619 = shalt.err (!%p2616_p3)
}
  0xea   : > { %s2620_s22 = scalar_lea.vmem %s428_s27, 16  ;;  %s2627_s23 = scalar_lea.vmem %s428_s27, 32 }
  0xeb   : > { %p2621_p10 = scmp.ne.s32.totalorder %s428_s27, %s2620_s22  ;;  %p2628_p13 = scmp.lt.s32.totalorder %s428_s27, %s428_s27 }
  0xec   : > { %p2629_p0 = scmp.lt.s32.totalorder %s2627_s23, %s2620_s22 }
  0xed   : > { %p2623_p11 = pnand %p2621_p10, %p3188_p7 }
  0xee   : > { %p2630_p2 = por %p2629_p0, %p2628_p13 }
  0xef   : > { %p2624_p12 = pneg %p2623_p11 }
  0xf1   : > { %p2631_p4 = pnand %p2630_p2, %p2624_p12 }
  0xf3   : > { %2634 = shalt.err (!%p2631_p4)
}
  0xf4   : > { %2179 = dma.hbm_to_vmem [thread:$0]  (!%p3172_p5), %s3829_s2, 16, %s428_s27, [#allocation8]  }
  0xf5   : > { %s3830_s4 = sld [smem:[#allocation53_spill]] }
  0xfb   : > { %s2635_s20 = scalar_lea.hbm %s3830_s4, 16 }
  0xfc   : > { %p2636_p6 = scmp.ne.s32.totalorder %s3830_s4, %s2635_s20  ;;  %p2642_p1 = scmp.lt.u32.totalorder %s2635_s20, %s3830_s4 }
  0xfe   : > { %p2638_p8 = pnand %p2636_p6, %p3188_p7 }
 0x100   : > { %p2639_p9 = pneg %p2638_p8 }
 0x102   : > { %p2644_p3 = pnand %p2642_p1, %p2639_p9 }
 0x104   : > { %2647 = shalt.err (!%p2644_p3)
}
 0x105   : > { %s2648_s18 = scalar_lea.vmem %s452_s19, 16  ;;  %s2655_s27 = scalar_lea.vmem %s452_s19, 32 }
 0x106   : > { %p2649_p10 = scmp.ne.s32.totalorder %s452_s19, %s2648_s18  ;;  %p2656_p13 = scmp.lt.s32.totalorder %s452_s19, %s452_s19 }
 0x107   : > { %p2657_p0 = scmp.lt.s32.totalorder %s2655_s27, %s2648_s18 }
 0x108   : > { %p2651_p11 = pnand %p2649_p10, %p3188_p7 }
 0x109   : > { %p2658_p2 = por %p2657_p0, %p2656_p13 }
 0x10a   : > { %p2652_p12 = pneg %p2651_p11 }
 0x10c   : > { %p2659_p4 = pnand %p2658_p2, %p2652_p12 }
 0x10e   : > { %2662 = shalt.err (!%p2659_p4)
}
 0x10f   : > { %2185 = dma.hbm_to_vmem [thread:$0]  (!%p3172_p5), %s3830_s4, 16, %s452_s19, [#allocation11]  }
 0x110   : > { %s2996_s23 = smov [#allocation15]   ;;  %s2997_s0 = smov [#allocation18]  }
 0x111   : > { %s475_s17 = sshll.u32 %s2996_s23, 4  ;;  %s499_s3 = sshll.u32 %s2997_s0, 4  ;;  %s476_s17 = int_to_ptr.vmem [resolvable:$true] %s475_s17  ;;  %s500_s3 = int_to_ptr.vmem [resolvable:$true] %s499_s3 }
 0x112   : > { %s3831_s6 = sld [smem:[#allocation55_spill]] }
 0x118   : > { %s2663_s15 = scalar_lea.hbm %s3831_s6, 16 }
 0x119   : > { %p2664_p6 = scmp.ne.s32.totalorder %s3831_s6, %s2663_s15  ;;  %p2670_p1 = scmp.lt.u32.totalorder %s2663_s15, %s3831_s6 }
 0x11b   : > { %p2666_p8 = pnand %p2664_p6, %p3188_p7 }
 0x11d   : > { %p2667_p9 = pneg %p2666_p8 }
 0x11f   : > { %p2672_p3 = pnand %p2670_p1, %p2667_p9 }
 0x121   : > { %2675 = shalt.err (!%p2672_p3)
}
 0x122   : > { %s2676_s19 = scalar_lea.vmem %s476_s17, 16  ;;  %s2683_s27 = scalar_lea.vmem %s476_s17, 32 }
 0x123   : > { %p2677_p10 = scmp.ne.s32.totalorder %s476_s17, %s2676_s19  ;;  %p2684_p13 = scmp.lt.s32.totalorder %s476_s17, %s476_s17 }
 0x124   : > { %p2685_p0 = scmp.lt.s32.totalorder %s2683_s27, %s2676_s19 }
 0x125   : > { %p2679_p11 = pnand %p2677_p10, %p3188_p7 }
 0x126   : > { %p2686_p2 = por %p2685_p0, %p2684_p13 }
 0x127   : > { %p2680_p12 = pneg %p2679_p11 }
 0x129   : > { %p2687_p4 = pnand %p2686_p2, %p2680_p12 }
 0x12b   : > { %2690 = shalt.err (!%p2687_p4)
}
 0x12c   : > { %2191 = dma.hbm_to_vmem [thread:$0]  (!%p3172_p5), %s3831_s6, 16, %s476_s17, [#allocation14]  }
 0x12d   : > { %s3832_s8 = sld [smem:[#allocation57_spill]] }
 0x133   : > { %s2691_s16 = scalar_lea.hbm %s3832_s8, 16 }
 0x134   : > { %p2692_p6 = scmp.ne.s32.totalorder %s3832_s8, %s2691_s16  ;;  %p2698_p1 = scmp.lt.u32.totalorder %s2691_s16, %s3832_s8 }
 0x136   : > { %p2694_p8 = pnand %p2692_p6, %p3188_p7 }
 0x138   : > { %p2695_p9 = pneg %p2694_p8 }
 0x13a   : > { %p2700_p3 = pnand %p2698_p1, %p2695_p9 }
 0x13c   : > { %2703 = shalt.err (!%p2700_p3)
}
 0x13d   : > { %s2704_s30 = scalar_lea.vmem %s500_s3, 16  ;;  %s2711_s17 = scalar_lea.vmem %s500_s3, 32 }
 0x13e   : > { %p2705_p10 = scmp.ne.s32.totalorder %s500_s3, %s2704_s30  ;;  %p2712_p13 = scmp.lt.s32.totalorder %s500_s3, %s500_s3 }
 0x13f   : > { %p2713_p0 = scmp.lt.s32.totalorder %s2711_s17, %s2704_s30 }
 0x140   : > { %p2707_p11 = pnand %p2705_p10, %p3188_p7 }
 0x141   : > { %p2714_p2 = por %p2713_p0, %p2712_p13 }
 0x142   : > { %p2708_p12 = pneg %p2707_p11 }
 0x144   : > { %p2715_p4 = pnand %p2714_p2, %p2708_p12 }
 0x146   : > { %2718 = shalt.err (!%p2715_p4)
}
 0x147   : > { %2197 = dma.hbm_to_vmem [thread:$0]  (!%p3172_p5), %s3832_s8, 16, %s500_s3, [#allocation17]  }
 0x148   : > { %s2998_s27 = smov [#allocation21]   ;;  %s2999_s22 = smov [#allocation24]  }
 0x149   : > { %s521_s24 = sshll.u32 %s2998_s27, 4  ;;  %s545_s23 = sshll.u32 %s2999_s22, 4  ;;  %s522_s24 = int_to_ptr.vmem [resolvable:$true] %s521_s24  ;;  %s546_s23 = int_to_ptr.vmem [resolvable:$true] %s545_s23 }
 0x14a   : > { %s2719_s20 = scalar_lea.hbm %s3777_s10, 16 }
 0x14b   : > { %p2720_p6 = scmp.ne.s32.totalorder %s3777_s10, %s2719_s20  ;;  %p2726_p1 = scmp.lt.u32.totalorder %s2719_s20, %s3777_s10 }
 0x14d   : > { %p2722_p8 = pnand %p2720_p6, %p3188_p7 }
 0x14f   : > { %p2723_p9 = pneg %p2722_p8 }
 0x151   : > { %p2728_p3 = pnand %p2726_p1, %p2723_p9 }
 0x153   : > { %2731 = shalt.err (!%p2728_p3)
}
 0x154   : > { %s2732_s3 = scalar_lea.vmem %s522_s24, 16  ;;  %s2739_s17 = scalar_lea.vmem %s522_s24, 32 }
 0x155   : > { %p2733_p10 = scmp.ne.s32.totalorder %s522_s24, %s2732_s3  ;;  %p2740_p13 = scmp.lt.s32.totalorder %s522_s24, %s522_s24 }
 0x156   : > { %p2741_p0 = scmp.lt.s32.totalorder %s2739_s17, %s2732_s3 }
 0x157   : > { %p2735_p11 = pnand %p2733_p10, %p3188_p7 }
 0x158   : > { %p2742_p2 = por %p2741_p0, %p2740_p13 }
 0x159   : > { %p2736_p12 = pneg %p2735_p11 }
 0x15b   : > { %p2743_p4 = pnand %p2742_p2, %p2736_p12 }
 0x15d   : > { %2746 = shalt.err (!%p2743_p4)
}
 0x15e   : > { %2203 = dma.hbm_to_vmem [thread:$0]  (!%p3172_p5), %s3777_s10, 16, %s522_s24, [#allocation20]  }
 0x15f   : > { %s2747_s0 = scalar_lea.hbm %s3779_s12, 16 }
 0x160   : > { %p2748_p6 = scmp.ne.s32.totalorder %s3779_s12, %s2747_s0  ;;  %p2754_p1 = scmp.lt.u32.totalorder %s2747_s0, %s3779_s12 }
 0x162   : > { %p2750_p8 = pnand %p2748_p6, %p3188_p7 }
 0x164   : > { %p2751_p9 = pneg %p2750_p8 }
 0x166   : > { %p2756_p3 = pnand %p2754_p1, %p2751_p9 }
 0x168   : > { %2759 = shalt.err (!%p2756_p3)
}
 0x169   : > { %s2760_s1 = scalar_lea.vmem %s546_s23, 16  ;;  %s2767_s24 = scalar_lea.vmem %s546_s23, 32 }
 0x16a   : > { %p2761_p10 = scmp.ne.s32.totalorder %s546_s23, %s2760_s1  ;;  %p2768_p13 = scmp.lt.s32.totalorder %s546_s23, %s546_s23 }
 0x16b   : > { %p2769_p0 = scmp.lt.s32.totalorder %s2767_s24, %s2760_s1 }
 0x16c   : > { %p2763_p11 = pnand %p2761_p10, %p3188_p7 }
 0x16d   : > { %p2770_p2 = por %p2769_p0, %p2768_p13 }
 0x16e   : > { %p2764_p12 = pneg %p2763_p11 }
 0x170   : > { %p2771_p4 = pnand %p2770_p2, %p2764_p12 }
 0x172   : > { %2774 = shalt.err (!%p2771_p4)
}
 0x173   : > { %2209 = dma.hbm_to_vmem [thread:$0]  (!%p3172_p5), %s3779_s12, 16, %s546_s23, [#allocation23]  }
 0x174   : > { %s3000_s17 = smov [#allocation27]   ;;  %s2775_s22 = scalar_lea.hbm %s3781_s14, 16 }
 0x175   : > { %s569_s18 = sshll.u32 %s3000_s17, 4  ;;  %p2776_p6 = scmp.ne.s32.totalorder %s3781_s14, %s2775_s22  ;;  %s570_s18 = int_to_ptr.vmem [resolvable:$true] %s569_s18 }
 0x176   : > { %p2782_p1 = scmp.lt.u32.totalorder %s2775_s22, %s3781_s14 }
 0x177   : > { %p2778_p8 = pnand %p2776_p6, %p3188_p7 }
 0x179   : > { %p2779_p9 = pneg %p2778_p8 }
 0x17b   : > { %p2784_p3 = pnand %p2782_p1, %p2779_p9 }
 0x17d   : > { %2787 = shalt.err (!%p2784_p3)
}
 0x17e   : > { %s2788_s23 = scalar_lea.vmem %s570_s18, 16  ;;  %s2795_s21 = scalar_lea.vmem %s570_s18, 32 }
 0x17f   : > { %p2789_p10 = scmp.ne.s32.totalorder %s570_s18, %s2788_s23  ;;  %p2796_p13 = scmp.lt.s32.totalorder %s570_s18, %s570_s18 }
 0x180   : > { %p2797_p0 = scmp.lt.s32.totalorder %s2795_s21, %s2788_s23 }
 0x181   : > { %p2791_p11 = pnand %p2789_p10, %p3188_p7 }
 0x182   : > { %p2798_p2 = por %p2797_p0, %p2796_p13 }
 0x183   : > { %p2792_p12 = pneg %p2791_p11 }
 0x185   : > { %p2799_p4 = pnand %p2798_p2, %p2792_p12 }
 0x187   : > { %2802 = shalt.err (!%p2799_p4)
}
 0x188   : > { %s3833_s30 = sld [smem:[#allocation46_spill]]  ;;  %s3834_s3 = sld [smem:[#allocation43_spill]] }
 0x189   : > { %s3835_s17 = sld [smem:[#allocation42_spill]]  ;;  %s3836_s25 = sld [smem:[#allocation41_spill]] }
 0x18a   : > { %s3837_s19 = sld [smem:[#allocation47_spill]]  ;;  %s1901_s22 = sadd.s32 4294967294, %s2983_s28  }
 0x18b   : > { %2215 = dma.hbm_to_vmem [thread:$0]  (!%p3172_p5), %s3781_s14, 16, %s570_s18, [#allocation26]  }
 0x18c   : > { %s3838_s27 = sld [smem:[#allocation40_spill]]  ;;  %s3839_s0 = sld [smem:[#allocation39_spill]] }
 0x18d   : > { %s47_s29 = sadd.s32 1, %s2975_s26  ;;  %p65_p8 = scmp.eq.s32.totalorder %s2983_s28, 0 }
 0x18e   : > { %p48_p7 = scmp.ge.s32.totalorder %s47_s29, 2  ;;  %s50_s16 = sadd.s32 1, %s3833_s30 }
 0x18f   : > { %s57_s20 = sadd.s32 1, %s3834_s3  ;;  %p64_p6 = scmp.ne.s32.totalorder %s3834_s3, %s3835_s17 }
 0x190   : > { %s3875_s29 = smov (%p48_p7, %s47_s29), 0  ;;  %s3877_s16 = smov (!%p48_p7, %s50_s16), %s3833_s30 }
 0x191   : > { %p70_p9 = scmp.ne.s32.totalorder %s3835_s17, %s3836_s25  ;;  %s3840_s18 = sld [smem:[#allocation38_spill]] }
 0x192   : > { %p52_p5 = scmp.ge.s32.totalorder %s3877_s16, 2  ;;  %s375_s15 = ssub.s32 %s2975_s26, %s3875_s29 }
 0x193   : > { %p3473_p1 = por %p65_p8, %p64_p6  ;;  %p3842_p3 = scmp.ne.s32.totalorder %s3837_s19, 0 }
 0x194   : > { %s3879_s16 = smov (%p52_p5, %s3877_s16), 0  ;;  %s379_s1 = sadd.s32 1, %s3838_s27 }
 0x195   : > { %p3479_p10 = por %p3842_p3, %p70_p9  ;;  %p389_p11 = scmp.ne.s32.totalorder %s3838_s27, %s3839_s0 }
 0x196   : > { %s54_s24 = ssub.s32 %s3833_s30, %s3879_s16  ;;  %s3844_s17 = sadd.s32 4294967295, %s2983_s28  }
 0x197   : > { %p390_p12 = scmp.eq.s32.totalorder %s3844_s17, 3  ;;  %p55_p13 = scmp.eq.s32.totalorder %s54_s24, 0 }
 0x198   : > { %s376_s25 = sor.u32 %s375_s15, %s54_s24  ;;  %p395_p4 = scmp.ne.s32.totalorder %s3839_s0, %s3840_s18 }
 0x199   : > { %p377_p0 = scmp.eq.s32.totalorder %s376_s25, 0  ;;  %p3492_p2 = por %p390_p12, %p389_p11 }
 0x19a   : > { %s3497_s2 = scalar_select %p55_p13, %s3834_s3, %s57_s20  }
 0x19b   : > { %s3845_s19 = scalar_select %p3492_p2, 1, 0 }
 0x19c   : > { %s3881_s27 = smov (!%p377_p0, %s3838_s27), %s379_s1  ;;  %p396_p7 = scmp.eq.s32.totalorder %s1901_s22, 3 }
 0x19d   : > { %p2238_p6 = scmp.lt.s32.totalorder %s2983_s28, 4  ;;  %s580_s4 = sand.u32 1, %s3834_s3  }
 0x19e   : > { %p3506_p8 = por %p396_p7, %p395_p4  ;;  %s1918_s17 = sshll.u32 %s580_s4, 4 }
 0x19f   : > { %s1984_s6 = sshll.u32 %s3833_s30, 8  ;;  %s3847_s25 = sld [smem:[#allocation49_spill]] }
 0x1a0   : > { %s3846_s5 = scalar_select %p3506_p8, 1, 0 }
 0x1a1   : > { %s584_s20 = scalar_lea.vmem [#allocation4], %s1918_s17  ;;  %p3518_p9 = pnand %p2238_p6, %p3473_p1 }
 0x1a2   : > { %s591_s0 = sshll.u32 %s584_s20, 4  ;;  %s3524_s30 = scalar_lea.sflag [#allocation5], %s580_s4  ;;  %s3522_s0 = int_to_ptr.vmem [resolvable:$true] %s591_s0 }
 0x1a3   : > { %p2805_p3 = pneg %p3518_p9 }
 0x1a5   : > { %s3848_s7 = smov %s3847_s25  ;;  %s3514_s8 = scalar_lea.hbm %s3847_s25, %s1984_s6 }
 0x1a6   : > { %s2803_s22 = scalar_lea.hbm %s3514_s8, 256  ;;  %s2808_s23 = scalar_lea.hbm %s3848_s7, 512 }
 0x1a7   : > { %p2804_p5 = scmp.ne.s32.totalorder %s3514_s8, %s2803_s22  ;;  %p2809_p1 = scmp.lt.u32.totalorder %s3514_s8, %s3848_s7 }
 0x1a8   : > { %p2810_p13 = scmp.lt.u32.totalorder %s2808_s23, %s2803_s22  ;;  %p2812_p4 = scmp.lt.u32.totalorder %s2803_s22, %s3514_s8 }
 0x1a9   : > { %p2806_p11 = pnand %p2805_p3, %p2804_p5 }
 0x1aa   : > { %p2811_p0 = por %p2810_p13, %p2809_p1 }
 0x1ab   : > { %p2807_p12 = pneg %p2806_p11 }
 0x1ac   : > { %p2813_p7 = por %p2812_p4, %p2811_p0 }
 0x1ae   : > { %p2814_p6 = pnand %p2813_p7, %p2807_p12 }
 0x1b0   : > { %2817 = shalt.err (!%p2814_p6)
}
 0x1b1   : > { %s2818_s4 = scalar_lea.vmem %s3522_s0, 256  ;;  %s3001_s15 = smov [#allocation4]  }
 0x1b2   : > { %p2819_p5 = scmp.ne.s32.totalorder %s3522_s0, %s2818_s4  ;;  %s2823_s24 = sshll.u32 %s3001_s15, 4  ;;  %s2824_s24 = int_to_ptr.vmem [resolvable:$false] %s2823_s24 }
 0x1b3   : > { %s2825_s25 = scalar_lea.vmem %s2824_s24, 512  ;;  %p2826_p2 = scmp.lt.s32.totalorder %s3522_s0, %s2824_s24 }
 0x1b4   : > { %p2821_p11 = pnand %p2819_p5, %p2805_p3  ;;  %p2827_p1 = scmp.lt.s32.totalorder %s2825_s25, %s2818_s4 }
 0x1b6   : > { %p2822_p8 = pneg %p2821_p11  ;;  %p2828_p13 = por %p2827_p1, %p2826_p2 }
 0x1b8   : > { %p2829_p0 = pnand %p2828_p13, %p2822_p8 }
 0x1ba   : > { %2832 = shalt.err (!%p2829_p0)
}
 0x1bb   : > { %s3002_s20 = smov 128   ;;  %s3003_s22 = smov 8  }
 0x1bc   : > { %2219 = dma.hbm_to_vmem [thread:$0]  (!%p3518_p9), %s3514_s8, 256, %s3522_s0, %s3524_s30, %s3002_s20, %s3002_s20, %s3003_s22  }
 0x1bd   : > { %s3850_s6 = sld [smem:[#allocation48_spill]] }
 0x1c3   : > { %p3851_p3 = scmp.ne.s32.totalorder %s3850_s6, 0 }
 0x1c4   : > { %s3852_s18 = sld [smem:[#allocation42_spill]] (!%p3851_p3) }
 0x1c5   : > { %603 = sbr.rel (%p3851_p3) target bundleno = 3583 (0xdff), region = 80 }
 0x1ca   : > { %s605_s23 = sand.u32 (!%p3851_p3), 1, %s3852_s18  }
 0x1cb   : > { %s1922_s1 = sshll.u32 (!%p3851_p3), %s605_s23, 4  ;;  %s606_s17 = scalar_lea.sflag (!%p3851_p3), [#allocation5], %s605_s23 }
 0x1cc   : > { %s3555_s4 = scalar_lea.vmem [#allocation4], %s1922_s1 }
 0x1cd   : > { %2906 = dma.done.wait (%p3479_p10), %s606_s17, 256  }
 0x1ce   : > { %2908 = vsyncadd (%p3479_p10), %s606_s17, 4294967040  ;;  %s3853_s15 = sld [smem:[#allocation47_spill]] }
 0x1d4   : > { %p3854_p2 = scmp.ne.s32.totalorder %s3853_s15, 0 }
 0x1d6   : > { %2910 = dma.done.wait (%p3854_p2), [#allocation8], 32  }
 0x1d7   : > { %2912 = vsyncadd (%p3854_p2), [#allocation8], 4294967264 }
 0x1d8   : > { %2914 = dma.done.wait (%p3854_p2), [#allocation11], 272  }
 0x1d9   : > { %2916 = vsyncadd (%p3854_p2), [#allocation11], 4294967024 }
 0x1da   : > { %2918 = dma.done.wait (%p3854_p2), [#allocation14], 272  }
 0x1db   : > { %2920 = vsyncadd (%p3854_p2), [#allocation14], 4294967024 }
 0x1dc   : > { %2922 = dma.done.wait (%p3854_p2), [#allocation17], 272  }
 0x1dd   : > { %2924 = vsyncadd (%p3854_p2), [#allocation17], 4294967024 }
 0x1de   : > { %2926 = dma.done.wait (%p3854_p2), [#allocation20], 32  }
 0x1df   : > { %2928 = vsyncadd (%p3854_p2), [#allocation20], 4294967264 }
 0x1e0   : > { %2930 = dma.done.wait (%p3854_p2), [#allocation23], 272  }
 0x1e1   : > { %2932 = vsyncadd (%p3854_p2), [#allocation23], 4294967024 }
 0x1e2   : > { %2934 = dma.done.wait (%p3854_p2), [#allocation26], 528  }
 0x1e3   : > { %2936 = vsyncadd (%p3854_p2), [#allocation26], 4294966768  ;;  %s3855_s8 = sld [smem:[#allocation39_spill]]  ;;  %s3856_s30 = sld [smem:[#allocation44_spill]] }
 0x1e9   : > { %s709_s21 = sand.u32 1, %s3855_s8   ;;  %p1938_p10 = scmp.ne.s32.totalorder %s3856_s30, 0 }
 0x1ea   : > { %s3592_s0 = sshll.u32 %s709_s21, 3  ;;  %v717_v0 = vld [vmem:[%s3555_s4] sm:$0xff] (!%p1938_p10)  ;;  %vm721_vm0 = vcmask (!%p1938_p10), 261120   ;;  %v718_v1 = vld [vmem:[%s3555_s4 + $0x8] sm:$0xff] (!%p1938_p10)  ;;  %v3004_v15 = vmov (!%p1938_p10), 0.0   ;;  %vm3005_vm1 = vmmov (!%p1938_p10), 0  }
 0x1eb   : > { %s711_s3 = scalar_lea.vmem [#allocation28], %s3592_s0  ;;  %716 = sbr.rel (%p1938_p10) target bundleno = 1029 (0x405), region = 144  ;;  %v722_v2 = vsel (!%p1938_p10), %vm721_vm0, %v717_v0, 0.0  ;;  %v725_v3 = vsel (!%p1938_p10), %vm721_vm0, %v718_v1, 0.0  ;;  %v2375_v14 = vld [vmem:[#allocation13] sm:$0xff] (!%p1938_p10)   ;;  %2021 = vmatprep.subr.bf16.mxu0 (!%p1938_p10), %v3004_v15  ;;  %v2376_v16 = vld [vmem:[#allocation13 + $0x8] sm:$0xff] (!%p1938_p10)   ;;  %2025 = vmatprep.mubr.msk.bf16.mxu0 (!%p1938_p10), %vm3005_vm1, %v3004_v15 }
 0x1ec   : > { %723 = vadd.xlane.f32.xlu0 (!%p1938_p10), %v722_v2  ;;  %2022 = vmatpush3.bf16.msra.mxu0 (!%p1938_p10), %v2375_v14  ;;  %v1939_v25 = vld [vmem:[#allocation7] ss:$0 sm:$0xff] (!%p1938_p10)  ;;  %v1940_v29 = vld [vmem:[#allocation9] ss:$0 sm:$0xff] (!%p1938_p10)  ;;  %v1941_v34 = vld [vmem:[#allocation15] ss:$0 sm:$0xff] (!%p1938_p10) }
 0x1ed   : > { %2023 = vmatprep.subr.bf16.mxu0 (!%p1938_p10), %v3004_v15  ;;  %vm834_vm2 = vcmask (!%p1938_p10), 523264  }
 0x1f0   : > { %726 = vadd.xlane.f32.xlu0 (!%p1938_p10), %v725_v3  ;;  %2024 = vmatpush3.bf16.msra.mxu0 (!%p1938_p10), %v2376_v16 }
 0x279   : > { %v724_v4 = vpop.xlane.xlu0 %723 }
 0x27a   : > { %v729_v5 = vmul.f32 0.03125, %v724_v4 }
 0x27c   : > { %v731_v6 = vsub.f32 %v717_v0, %v729_v5 }
 0x27d   : > { %v727_v7 = vpop.xlane.xlu0 %726 }
 0x27e   : > { %v730_v8 = vmul.f32 0.03125, %v727_v7  ;;  %v733_v9 = vmul.f32 %v731_v6, %v731_v6 }
 0x280   : > { %v732_v10 = vsub.f32 %v718_v1, %v730_v8  ;;  %v735_v11 = vsel %vm721_vm0, %v733_v9, 0.0 }
 0x281   : > { %736 = vadd.xlane.f32.xlu1 %v735_v11 }
 0x282   : > { %v734_v12 = vmul.f32 %v732_v10, %v732_v10 }
 0x284   : > { %v738_v13 = vsel %vm721_vm0, %v734_v12, 0.0 }
 0x285   : > { %739 = vadd.xlane.f32.xlu1 %v738_v13 }
 0x30e   : > { %v737_v17 = vpop.xlane.xlu1 %736 }
 0x30f   : > { %v741_v18 = vmul.f32 0.03125, %v737_v17 }
 0x311   : > { %v743_v19 = vadd.f32 1e-05, %v741_v18 }
 0x312   : > { %v740_v20 = vpop.xlane.xlu1 %739 }
 0x313   : > { %2377 = vrsqrt.f32 %v743_v19  ;;  %v742_v21 = vmul.f32 0.03125, %v740_v20 }
 0x315   : > { %v744_v22 = vadd.f32 1e-05, %v742_v21 }
 0x317   : > { %2379 = vrsqrt.f32 %v744_v22 }
 0x31d   : > { %v2378_v23 = vpop.eup %2377 }
 0x31e   : > { %v747_v24 = vmul.f32 %v2378_v23, %v731_v6 }
 0x320   : > { %v755_v28 = vmul.f32 %v1939_v25, %v747_v24 }
 0x321   : > { %v2380_v26 = vpop.eup %2379 }
 0x322   : > { %v748_v27 = vmul.f32 %v2380_v26, %v732_v10  ;;  %v763_v31 = vadd.f32 %v1940_v29, %v755_v28 }
 0x324   : > { %v756_v30 = vmul.f32 %v1939_v25, %v748_v27 }
 0x326   : > { %v764_v32 = vadd.f32 %v1940_v29, %v756_v30 }
 0x328   : > { %v765_v33 = vpack.c.bf16 %v764_v32, %v763_v31 }
 0x32a   : > { %2026 = vmatmul.mubr.msk.bf16.vlgmr.msra.gmra.mrb[0].mxu0 %vm721_vm0, %v765_v33 }
 0x3fd   : > { %v826_v35 = vpop.f32.mrb[0].mxu0 }
 0x3fe   : > { %v2027_v36 = vpop.f32.mrb[1].mxu0  ;;  %v827_v38 = vadd.f32 %v1941_v34, %v826_v35 }
 0x3ff   : > { %v829_v37 = vpop.f32.mrb[2].mxu0 }
 0x400   : > { %v830_v39 = vadd.f32 %v1941_v34, %v829_v37  ;;  %v2028_v40 = vpop.f32.mrb[3].mxu0 }
 0x402   : > { %v833_v41 = vpack.c.bf16 %v830_v39, %v827_v38 }
 0x404   : > { %835 = vst.msk [vmem:[#allocation2] sm:$0xff] %vm834_vm2, %v833_v41 }
 0x405 PF: > { %s3857_s24 = sld [smem:[#allocation44_spill]]  ;;  %vm841_vm3 = vcmask 261120   ;;  %v2381_v49 = vld [vmem:[#allocation10] sm:$0xff]   ;;  %v3006_v50 = vmov 0.0   ;;  %vm3007_vm4 = vmmov 0   ;;  %v2382_v51 = vld [vmem:[#allocation10 + $0x8] sm:$0xff]   ;;  %v938_v16 = vlaneseq }
 0x406   : > { %2029 = vmatprep.subr.bf16.mxu0 %v3006_v50  ;;  %2033 = vmatprep.mubr.msk.bf16.mxu0 %vm3007_vm4, %v3006_v50  ;;  %vm947_vm5 = vcmask 64512   ;;  %s3008_s22 = smov 120   ;;  %v1946_v58 = vld [vmem:[#allocation7] ss:$0 sm:$0xff]  ;;  %v1947_v60 = vld [vmem:[#allocation9] ss:$0 sm:$0xff] }
 0x407   : > { %2030 = vmatpush3.bf16.msra.mxu0 %v2381_v49  ;;  %2037 = vmatprep.subr.bf16.mxu1 %v3006_v50  ;;  %s3009_s6 = smov 112   ;;  %v1948_v0 = vld [vmem:[#allocation12] ss:$0 sm:$0xff]  ;;  %s3010_s18 = smov 104   ;;  %v939_v17 = vshrl.u32 %v938_v16, 7  ;;  %v943_v20 = vand.u32 127, %v938_v16 }
 0x408   : > { %2031 = vmatprep.subr.bf16.mxu0 %v3006_v50  ;;  %2039 = vmatprep.mubr.msk.bf16.mxu1 %vm3007_vm4, %v3006_v50  ;;  %v3011_v21 = vmov -1e+09   ;;  %vm994_vm7 = vcmask 130048   ;;  %s3012_s23 = smov 88   ;;  %s3013_s1 = smov 96   ;;  %vm1055_vm8 = vcmask 60416  }
 0x409   : > { %s3014_s17 = smov 72   ;;  %s3016_s15 = smov 8   ;;  %vm1175_vm9 = vcmask 126016   ;;  %vm1294_vm10 = vcmask 191616   ;;  %vm1413_vm11 = vcmask 257216   ;;  %vm1620_vm12 = vcmask 523264  }
 0x40a   : > { %s3017_s8 = smov 16   ;;  %s3018_s30 = smov 24  }
 0x40b   : > { %s1945_s25 = sshll.u32 %s3857_s24, 3  ;;  %2032 = vmatpush3.bf16.msra.mxu0 %v2382_v51  ;;  %v3621_v52 = vld [vmem:[#allocation2] sm:$0xff]  ;;  %p3861_p9 = scmp.ne.s32.totalorder %s3845_s19, 0 }
 0x40c   : > { %s837_s20 = scalar_lea.vmem %s3555_s4, %s1945_s25 [#allocation4]  ;;  %2043 = vmatprep.subr.bf16.mxu0 %v3006_v50  ;;  %1062 = vrot.lane.b32.xlu1 %v3621_v52, %s3008_s22  ;;  %v952_v53 = vsel %vm947_vm5, %v3621_v52, 0  ;;  %v940_v18 = vstv %s1945_s25  ;;  %s3015_s4 = smov 80  }
 0x40d   : > { %v3607_v42 = vld [vmem:[%s837_s20] sm:$0xff]  ;;  %2038 = vmatpush3.bf16.xpose.msra.mxu1 %v952_v53  ;;  %v941_v19 = vadd.s32 %v940_v18, %v939_v17  ;;  %s3858_s25 = sld [smem:[#allocation45_spill]] }
 0x40e   : > { %v842_v43 = vsel %vm841_vm3, %v3607_v42, 0.0  ;;  %2049 = vmatprep.subr.bf16.mxu1 %v3006_v50 }
 0x40f   : > { %843 = vadd.xlane.f32.xlu0 %v842_v43  ;;  %vm944_vm6 = vcmp.le.s32.totalorder %v943_v20, %v941_v19 }
 0x410   : > { %v945_v22 = vsel %vm944_vm6, 0.0, %v3011_v21 }
 0x47e   : > { %v1063_v2 = vpop.permute.xlu1 %1062 }
 0x47f   : > { %v1068_v8 = vsel %vm947_vm5, %v1063_v2, 0 }
 0x49c   : > { %v844_v44 = vpop.xlane.xlu0 %843 }
 0x49d   : > { %v846_v45 = vmul.f32 0.03125, %v844_v44 }
 0x49f   : > { %v847_v46 = vsub.f32 %v3607_v42, %v846_v45 }
 0x4a1   : > { %v848_v47 = vmul.f32 %v847_v46, %v847_v46 }
 0x4a3   : > { %v849_v48 = vsel %vm841_vm3, %v848_v47, 0.0 }
 0x4a4   : > { %850 = vadd.xlane.f32.xlu0 %v849_v48 }
 0x4ba   : > { %1181 = vrot.lane.b32.xlu0 %v3621_v52, %s3009_s6 }
 0x531   : > { %v851_v54 = vpop.xlane.xlu0 %850 }
 0x532   : > { %v852_v55 = vmul.f32 0.03125, %v851_v54 }
 0x534   : > { %v853_v56 = vadd.f32 1e-05, %v852_v55 }
 0x535   : > { %v1182_v9 = vpop.permute.xlu0 %1181 }
 0x536   : > { %2391 = vrsqrt.f32 %v853_v56  ;;  %v1187_v10 = vsel %vm947_vm5, %v1182_v9, 0 }
 0x540   : > { %v2392_v57 = vpop.eup %2391 }
 0x541   : > { %v855_v59 = vmul.f32 %v2392_v57, %v847_v46 }
 0x543   : > { %v862_v61 = vmul.f32 %v1946_v58, %v855_v59 }
 0x545   : > { %v869_v62 = vadd.f32 %v1947_v60, %v862_v61 }
 0x547   : > { %v870_v63 = vpack.c.bf16 %v869_v62, %v869_v62 }
 0x549   : > { %2034 = vmatmul.mubr.msk.bf16.vlgmr.msra.gmra.mrb[0].mxu0 %vm841_vm3, %v870_v63 }
 0x54a   : > { %2045 = vmatprep.mubr.msk.bf16.mxu0 %vm3007_vm4, %v3006_v50 }
 0x61c   : > { %v931_v1 = vpop.f32.mrb[0].mxu0 }
 0x61d   : > { %v932_v3 = vadd.f32 %v1948_v0, %v931_v1  ;;  %v2035_v4 = vpop.f32.mrb[1].mxu0 }
 0x61e   : > { %v934_v5 = vpop.f32.mrb[2].mxu0 }
 0x61f   : > { %v937_v6 = vpack.c.bf16 %v932_v3, %v932_v3  ;;  %v2036_v7 = vpop.f32.mrb[3].mxu0 }
 0x621   : > { %1059 = vrot.lane.b32.xlu1 %v937_v6, %s3008_s22  ;;  %2040 = vmatmul.mubr.msk.bf16.vlgmr.msra.gmra.mrb[0].mxu1 %vm947_vm5, %v937_v6  ;;  %s1980_s22 = sshll.u32 %s3858_s25, 1 }
 0x622   : > { %2050 = vmatpush3.bf16.xpose.msra.mxu1 %v1068_v8  ;;  %2051 = vmatprep.mubr.msk.bf16.mxu1 %vm3007_vm4, %v3006_v50 }
 0x623   : > { %2061 = vmatprep.subr.bf16.mxu1 %v3006_v50 }
 0x625   : > { %1178 = vrot.lane.b32.xlu1 %v937_v6, %s3009_s6  ;;  %s1678_s6 = sadd.s32 %s3857_s24, %s1980_s22  ;;  %s1667_s24 = scalar_lea.sflag [#allocation6], %s709_s21 }
 0x629   : > { %1300 = vrot.lane.b32.xlu1 %v3621_v52, %s3010_s18 }
 0x62d   : > { %1297 = vrot.lane.b32.xlu1 %v937_v6, %s3010_s18  ;;  %s1981_s18 = sshll.u32 %s1678_s6, 7 }
 0x693   : > { %v1060_v11 = vpop.permute.xlu1 %1059 }
 0x694   : > { %2052 = vmatmul.mubr.msk.bf16.vlgmr.msra.gmra.mrb[4].mxu1 %vm947_vm5, %v1060_v11 }
 0x695   : > { %2062 = vmatpush3.bf16.xpose.msra.mxu1 %v1187_v10  ;;  %2063 = vmatprep.mubr.msk.bf16.mxu1 %vm3007_vm4, %v3006_v50 }
 0x696   : > { %2073 = vmatprep.subr.bf16.mxu1 %v3006_v50 }
 0x697   : > { %v1179_v12 = vpop.permute.xlu1 %1178 }
 0x69b   : > { %v1301_v13 = vpop.permute.xlu1 %1300 }
 0x69c   : > { %v1306_v14 = vsel %vm947_vm5, %v1301_v13, 0  ;;  %2064 = vmatmul.mubr.msk.bf16.vlgmr.msra.gmra.mrb[8].mxu1 %vm947_vm5, %v1179_v12 }
 0x69d   : > { %2074 = vmatpush3.bf16.xpose.msra.mxu1 %v1306_v14  ;;  %2075 = vmatprep.mubr.msk.bf16.mxu1 %vm3007_vm4, %v3006_v50 }
 0x69e   : > { %2085 = vmatprep.subr.bf16.mxu1 %v3006_v50 }
 0x69f   : > { %v1298_v15 = vpop.permute.xlu1 %1297 }
 0x6a4   : > { %2076 = vmatmul.mubr.msk.bf16.vlgmr.msra.gmra.mrb[12].mxu1 %vm947_vm5, %v1298_v15 }
 0x6a5   : > { %2089 = vmatprep.mubr.msk.bf16.mxu1 %vm3007_vm4, %v3006_v50 }
 0x6f4   : > { %v988_v23 = vpop.f32.mrb[0].mxu1 }
 0x6f5   : > { %v989_v24 = vadd.f32 %v988_v23, %v945_v22  ;;  %v2041_v25 = vpop.f32.mrb[1].mxu1 }
 0x6f6   : > { %v991_v26 = vpop.f32.mrb[2].mxu1 }
 0x6f7   : > { %v2042_v27 = vpop.f32.mrb[3].mxu1  ;;  %v995_v28 = vsel %vm994_vm7, %v989_v24, -inf }
 0x6f8   : > { %996 = vmax.xlane.f32.xlu1 %v995_v28 }
 0x767   : > { %v1104_v29 = vpop.f32.mrb[4].mxu1 }
 0x768   : > { %v1105_v30 = vadd.f32 %v1104_v29, %v945_v22  ;;  %v2053_v31 = vpop.f32.mrb[5].mxu1 }
 0x769   : > { %v1107_v32 = vpop.f32.mrb[6].mxu1 }
 0x76a   : > { %v2054_v33 = vpop.f32.mrb[7].mxu1  ;;  %v1110_v34 = vsel %vm994_vm7, %v1105_v30, -inf }
 0x76b   : > { %1111 = vmax.xlane.f32.xlu0 %v1110_v34 }
 0x76f   : > { %v1223_v35 = vpop.f32.mrb[8].mxu1 }
 0x770   : > { %v1224_v36 = vadd.f32 %v1223_v35, %v945_v22  ;;  %v2065_v37 = vpop.f32.mrb[9].mxu1  ;;  %v2383_v35 = vld [vmem:[#allocation16] sm:$0xff]  }
 0x771   : > { %v1226_v38 = vpop.f32.mrb[10].mxu1  ;;  %2086 = vmatpush3.bf16.msra.mxu1 %v2383_v35 }
 0x772   : > { %v2066_v39 = vpop.f32.mrb[11].mxu1  ;;  %v1229_v40 = vsel %vm994_vm7, %v1224_v36, -inf  ;;  %2087 = vmatprep.subr.bf16.mxu1 %v3006_v50 }
 0x773   : > { %1230 = vmax.xlane.f32.xlu1 %v1229_v40 }
 0x777   : > { %v1342_v41 = vpop.f32.mrb[12].mxu1 }
 0x778   : > { %v1343_v43 = vadd.f32 %v1342_v41, %v945_v22  ;;  %v2077_v44 = vpop.f32.mrb[13].mxu1 }
 0x779   : > { %v1345_v45 = vpop.f32.mrb[14].mxu1 }
 0x77a   : > { %v2078_v46 = vpop.f32.mrb[15].mxu1  ;;  %v1348_v47 = vsel %vm994_vm7, %v1343_v43, -inf }
 0x77b   : > { %1349 = vmax.xlane.f32.xlu1 %v1348_v47 }
 0x785   : > { %v997_v48 = vpop.xlane.xlu1 %996 }
 0x786   : > { %v998_v49 = vsub.f32 %v989_v24, %v997_v48 }
 0x788   : > { %v999_v51 = vmul.f32 1.442695, %v998_v49 }
 0x78a   : > { %2393 = vpow2.f32 %v999_v51 }
 0x794   : > { %v2394_v53 = vpop.eup %2393 }
 0x795   : > { %v1001_v54 = vsel %vm994_vm7, %v2394_v53, 0.0 }
 0x796   : > { %1002 = vadd.xlane.f32.xlu0 %v1001_v54  ;;  %v1963_v54 = vld [vmem:[#allocation18] ss:$0 sm:$0xff] }
 0x7f8   : > { %v1112_v55 = vpop.xlane.xlu0 %1111 }
 0x7f9   : > { %v1113_v56 = vsub.f32 %v1105_v30, %v1112_v55 }
 0x7fb   : > { %v1114_v57 = vmul.f32 1.442695, %v1113_v56 }
 0x7fd   : > { %2395 = vpow2.f32 %v1114_v57 }
 0x800   : > { %v1231_v58 = vpop.xlane.xlu1 %1230 }
 0x801   : > { %v1232_v59 = vsub.f32 %v1224_v36, %v1231_v58  ;;  %v2384_v36 = vld [vmem:[#allocation16 + $0x8] sm:$0xff]  }
 0x802   : > { %2088 = vmatpush3.bf16.msra.mxu1 %v2384_v36 }
 0x803   : > { %v1233_v60 = vmul.f32 1.442695, %v1232_v59  ;;  %2101 = vmatprep.subr.bf16.mxu1 %v3006_v50 }
 0x805   : > { %2397 = vpow2.f32 %v1233_v60 }
 0x807   : > { %v2396_v61 = vpop.eup %2395 }
 0x808   : > { %v1116_v62 = vsel %vm994_vm7, %v2396_v61, 0.0  ;;  %v1350_v1 = vpop.xlane.xlu1 %1349 }
 0x809   : > { %1117 = vadd.xlane.f32.xlu1 %v1116_v62  ;;  %v1351_v2 = vsub.f32 %v1343_v43, %v1350_v1 }
 0x80b   : > { %v1352_v3 = vmul.f32 1.442695, %v1351_v2 }
 0x80d   : > { %2399 = vpow2.f32 %v1352_v3  ;;  %v2385_v3 = vld [vmem:[#allocation22] sm:$0xff]  }
 0x80f   : > { %v2398_v63 = vpop.eup %2397 }
 0x810   : > { %v1235_v0 = vsel %vm994_vm7, %v2398_v63, 0.0 }
 0x811   : > { %1236 = vadd.xlane.f32.xlu0 %v1235_v0 }
 0x817   : > { %v2400_v4 = vpop.eup %2399 }
 0x818   : > { %v1354_v5 = vsel %vm994_vm7, %v2400_v4, 0.0 }
 0x81a   : > { %1122 = vrot.lane.b32.xlu1 %v3621_v52, %s3012_s23  ;;  %s1682_s23 = sshll.u32 %s711_s3, 4  ;;  %s3702_s23 = int_to_ptr.vmem [resolvable:$true] %s1682_s23 }
 0x823   : > { %v1003_v6 = vpop.xlane.xlu0 %1002 }
 0x824   : > { %2401 = vrcp.f32 %v1003_v6 }
 0x827   : > { %1008 = vrot.lane.b32.xlu0 %v3621_v52, %s3013_s1 }
 0x82b   : > { %1360 = vrot.lane.b32.xlu0 %v3621_v52, %s3014_s17 }
 0x82e   : > { %v2402_v8 = vpop.eup %2401 }
 0x82f   : > { %v1005_v10 = vmul.f32 %v2402_v8, %v2394_v53 }
 0x831   : > { %v1006_v12 = vpack.c.bf16 %v1005_v10, %v1005_v10  ;;  %v1967_v10 = vld [vmem:[#allocation19] ss:$0 sm:$0xff] }
 0x83e   : > { %1355 = vadd.xlane.f32.xlu1 %v1354_v5  ;;  %v2387_v5 = vld [vmem:[#allocation25] sm:$0xff]  }
 0x84f   : > { %1241 = vrot.lane.b32.xlu1 %v3621_v52, %s3015_s4  ;;  %s3860_s4 = sld [smem:[#allocation58_spill]] }
 0x896   : > { %v1118_v7 = vpop.xlane.xlu1 %1117 }
 0x897   : > { %2403 = vrcp.f32 %v1118_v7 }
 0x89a   : > { %v1123_v14 = vpop.permute.xlu1 %1122 }
 0x89e   : > { %v1237_v9 = vpop.xlane.xlu0 %1236 }
 0x89f   : > { %2405 = vrcp.f32 %v1237_v9 }
 0x8a1   : > { %v2404_v13 = vpop.eup %2403 }
 0x8a2   : > { %v1009_v11 = vpop.permute.xlu0 %1008  ;;  %v1120_v52 = vmul.f32 %v2404_v13, %v2396_v61 }
 0x8a3   : > { %2044 = vmatpush3.bf16.msra.mxu0 %v1009_v11 }
 0x8a4   : > { %2055 = vmatprep.subr.bf16.mxu0 %v3006_v50  ;;  %v1121_v15 = vpack.c.bf16 %v1120_v52, %v1120_v52 }
 0x8a6   : > { %2046 = vmatmul.mubr.msk.bf16.vlgmr.msra.gmra.mrb[4].mxu0 %vm994_vm7, %v1006_v12  ;;  %v1361_v21 = vpop.permute.xlu0 %1360  ;;  %v1968_v12 = vld [vmem:[#allocation21] ss:$0 sm:$0xff] }
 0x8a7   : > { %2056 = vmatpush3.bf16.msra.mxu0 %v1123_v14  ;;  %2057 = vmatprep.mubr.msk.bf16.mxu0 %vm3007_vm4, %v3006_v50 }
 0x8a8   : > { %2067 = vmatprep.subr.bf16.mxu0 %v3006_v50 }
 0x8a9   : > { %v2406_v16 = vpop.eup %2405 }
 0x8aa   : > { %v1239_v18 = vmul.f32 %v2406_v16, %v2398_v63  ;;  %v2390_v16 = vld [vmem:[#allocation25 + $0x18] sm:$0xff]  }
 0x8ac   : > { %v1240_v20 = vpack.c.bf16 %v1239_v18, %v1239_v18 }
 0x8ae   : > { %2058 = vmatmul.mubr.msk.bf16.vlgmr.msra.gmra.mrb[8].mxu0 %vm994_vm7, %v1121_v15  ;;  %v2389_v15 = vld [vmem:[#allocation25 + $0x10] sm:$0xff]  }
 0x8af   : > { %2069 = vmatprep.mubr.msk.bf16.mxu0 %vm3007_vm4, %v3006_v50 }
 0x8cb   : > { %v1356_v17 = vpop.xlane.xlu1 %1355 }
 0x8cc   : > { %2407 = vrcp.f32 %v1356_v17  ;;  %v1969_v17 = vld [vmem:[#allocation24] ss:$0 sm:$0xff] }
 0x8cf   : > { %v1242_v19 = vpop.permute.xlu1 %1241 }
 0x8d0   : > { %2068 = vmatpush3.bf16.msra.mxu0 %v1242_v19 }
 0x8d1   : > { %2079 = vmatprep.subr.bf16.mxu0 %v3006_v50 }
 0x8d3   : > { %2070 = vmatmul.mubr.msk.bf16.vlgmr.msra.gmra.mrb[12].mxu0 %vm994_vm7, %v1240_v20 }
 0x8d4   : > { %2080 = vmatpush3.bf16.msra.mxu0 %v1361_v21  ;;  %2081 = vmatprep.mubr.msk.bf16.mxu0 %vm3007_vm4, %v3006_v50 }
 0x8d5   : > { %2093 = vmatprep.subr.bf16.mxu0 %v3006_v50 }
 0x8d6   : > { %v2408_v22 = vpop.eup %2407 }
 0x8d7   : > { %v1358_v23 = vmul.f32 %v2408_v22, %v2400_v4  ;;  %v2386_v4 = vld [vmem:[#allocation22 + $0x8] sm:$0xff]  }
 0x8d9   : > { %v1359_v24 = vpack.c.bf16 %v1358_v23, %v1358_v23 }
 0x8db   : > { %2082 = vmatmul.mubr.msk.bf16.vlgmr.msra.gmra.mrb[16].mxu0 %vm994_vm7, %v1359_v24 }
 0x8dc   : > { %2097 = vmatprep.mubr.msk.bf16.mxu0 %vm3007_vm4, %v3006_v50  ;;  %2094 = vmatpush3.bf16.msra.mxu0 %v2385_v3 }
 0x8dd   : > { %2095 = vmatprep.subr.bf16.mxu0 %v3006_v50 }
 0x8e0   : > { %2096 = vmatpush3.bf16.msra.mxu0 %v2386_v4 }
 0x979   : > { %v1048_v25 = vpop.f32.mrb[4].mxu0 }
 0x97a   : > { %v1054_v26 = vpack.c.bf16 %v1048_v25, %v1048_v25  ;;  %v2047_v27 = vpop.f32.mrb[5].mxu0  ;;  %v1973_v25 = vld [vmem:[#allocation27] ss:$0 sm:$0xff] }
 0x97b   : > { %v1051_v28 = vpop.f32.mrb[6].mxu0 }
 0x97c   : > { %1056 = vst.msk [vmem:[#allocation3] sm:$0xf] %vm1055_vm8, %v1054_v26  ;;  %v2048_v29 = vpop.f32.mrb[7].mxu0 }
 0x981   : > { %v1162_v30 = vpop.f32.mrb[8].mxu0 }
 0x982   : > { %v1985_v31 = vpack.c.bf16 %v1162_v30, %v1162_v30  ;;  %v2059_v32 = vpop.f32.mrb[9].mxu0 }
 0x983   : > { %v1165_v33 = vpop.f32.mrb[10].mxu0 }
 0x984   : > { %1172 = vrot.lane.b32.xlu1 %v1985_v31, %s3016_s15  ;;  %v2060_v34 = vpop.f32.mrb[11].mxu0  ;;  %s3700_s15 = scalar_lea.hbm %s3860_s4, %s1981_s18 }
 0x9a6   : > { %v1281_v37 = vpop.f32.mrb[12].mxu0 }
 0x9a7   : > { %v1986_v38 = vpack.c.bf16 %v1281_v37, %v1281_v37  ;;  %v2071_v39 = vpop.f32.mrb[13].mxu0 }
 0x9a8   : > { %v1284_v40 = vpop.f32.mrb[14].mxu0 }
 0x9a9   : > { %1291 = vrot.lane.b32.xlu0 %v1986_v38, %s3017_s8  ;;  %v2072_v41 = vpop.f32.mrb[15].mxu0  ;;  %s2833_s8 = scalar_lea.vmem %s3702_s23, 128 }
 0x9aa   : > { %p2834_p8 = scmp.ne.s32.totalorder %s3702_s23, %s2833_s8 }
 0x9ac   : > { %p2835_p12 = pnand %p2834_p8, %p3861_p9 }
 0x9ae   : > { %v1400_v43 = vpop.f32.mrb[16].mxu0  ;;  %p2836_p4 = pneg %p2835_p12 }
 0x9af   : > { %v1987_v44 = vpack.c.bf16 %v1400_v43, %v1400_v43  ;;  %v2083_v45 = vpop.f32.mrb[17].mxu0 }
 0x9b0   : > { %v1403_v46 = vpop.f32.mrb[18].mxu0 }
 0x9b1   : > { %1410 = vrot.lane.b32.xlu1 %v1987_v44, %s3018_s30  ;;  %v2084_v47 = vpop.f32.mrb[19].mxu0  ;;  %s3019_s30 = smov [#allocation28]  }
 0x9b2   : > { %s2837_s25 = sshll.u32 %s3019_s30, 4  ;;  %s2838_s25 = int_to_ptr.vmem [resolvable:$false] %s2837_s25 }
 0x9b3   : > { %s2839_s22 = scalar_lea.vmem %s2838_s25, 256  ;;  %p2840_p7 = scmp.lt.s32.totalorder %s3702_s23, %s2838_s25 }
 0x9b4   : > { %p2841_p6 = scmp.lt.s32.totalorder %s2839_s22, %s2833_s8 }
 0x9b6   : > { %p2842_p5 = por %p2841_p6, %p2840_p7 }
 0x9b8   : > { %p2843_p11 = pnand %p2842_p5, %p2836_p4 }
 0x9f6   : > { %v1173_v48 = vpop.permute.xlu1 %1172 }
 0x9f7   : > { %1176 = vst.msk [vmem:[#allocation3] sm:$0xf] %vm1175_vm9, %v1173_v48 }
 0xa1b   : > { %v1292_v49 = vpop.permute.xlu0 %1291 }
 0xa1c   : > { %1295 = vst.msk [vmem:[#allocation3] sm:$0xf] %vm1294_vm10, %v1292_v49 }
 0xa23   : > { %v1411_v51 = vpop.permute.xlu1 %1410 }
 0xa24   : > { %1414 = vst.msk [vmem:[#allocation3] sm:$0xf] %vm1413_vm11, %v1411_v51 }
 0xa2b   : > { %v1415_v53 = vld [vmem:[#allocation3] sm:$0xf] }
 0xa2c   : > { %2090 = vmatmul.mubr.msk.bf16.vlgmr.msra.gmra.mrb[16].mxu1 %vm841_vm3, %v1415_v53 }
 0xa2d   : > { %2109 = vmatprep.mubr.msk.bf16.mxu1 %vm3007_vm4, %v3006_v50  ;;  %2102 = vmatpush3.bf16.msra.mxu1 %v2387_v5 }
 0xa2e   : > { %2103 = vmatprep.subr.bf16.mxu1 %v3006_v50 }
 0xaff   : > { %v1476_v55 = vpop.f32.mrb[16].mxu1 }
 0xb00   : > { %v1477_v56 = vadd.f32 %v1963_v54, %v1476_v55  ;;  %v2091_v57 = vpop.f32.mrb[17].mxu1 }
 0xb01   : > { %v1479_v58 = vpop.f32.mrb[18].mxu1 }
 0xb02   : > { %v1482_v59 = vadd.f32 %v1477_v56, %v3607_v42  ;;  %v2092_v60 = vpop.f32.mrb[19].mxu1  ;;  %v2388_v42 = vld [vmem:[#allocation25 + $0x8] sm:$0xff]  }
 0xb03   : > { %2104 = vmatpush3.bf16.msra.mxu1 %v2388_v42 }
 0xb04   : > { %v1485_v61 = vsel %vm841_vm3, %v1482_v59, 0.0  ;;  %2105 = vmatprep.subr.bf16.mxu1 %v3006_v50 }
 0xb05   : > { %1486 = vadd.xlane.f32.xlu0 %v1485_v61 }
 0xb07   : > { %2106 = vmatpush3.bf16.msra.mxu1 %v2389_v15 }
 0xb08   : > { %2107 = vmatprep.subr.bf16.mxu1 %v3006_v50 }
 0xb0b   : > { %2108 = vmatpush3.bf16.msra.mxu1 %v2390_v16 }
 0xb92   : > { %v1487_v62 = vpop.xlane.xlu0 %1486 }
 0xb93   : > { %v1488_v63 = vmul.f32 0.03125, %v1487_v62 }
 0xb95   : > { %v1489_v0 = vsub.f32 %v1482_v59, %v1488_v63 }
 0xb97   : > { %v1490_v1 = vmul.f32 %v1489_v0, %v1489_v0 }
 0xb99   : > { %v1491_v2 = vsel %vm841_vm3, %v1490_v1, 0.0 }
 0xb9a   : > { %1492 = vadd.xlane.f32.xlu1 %v1491_v2 }
 0xc27   : > { %v1493_v6 = vpop.xlane.xlu1 %1492 }
 0xc28   : > { %v1494_v7 = vmul.f32 0.03125, %v1493_v6 }
 0xc2a   : > { %v1495_v8 = vadd.f32 1e-05, %v1494_v7 }
 0xc2c   : > { %2409 = vrsqrt.f32 %v1495_v8 }
 0xc36   : > { %v2410_v9 = vpop.eup %2409 }
 0xc37   : > { %v1497_v11 = vmul.f32 %v2410_v9, %v1489_v0 }
 0xc39   : > { %v1504_v13 = vmul.f32 %v1967_v10, %v1497_v11 }
 0xc3b   : > { %v1511_v14 = vadd.f32 %v1968_v12, %v1504_v13 }
 0xc3d   : > { %v1512_v52 = vpack.c.bf16 %v1511_v14, %v1511_v14 }
 0xc3f   : > { %2098 = vmatmul.mubr.msk.bf16.vlgmr.msra.gmra.mrb[20].mxu0 %vm841_vm3, %v1512_v52 }
 0xd12   : > { %v1573_v18 = vpop.f32.mrb[20].mxu0 }
 0xd13   : > { %v1574_v19 = vadd.f32 %v1969_v17, %v1573_v18  ;;  %v2099_v20 = vpop.f32.mrb[21].mxu0 }
 0xd14   : > { %v1576_v21 = vpop.f32.mrb[22].mxu0 }
 0xd15   : > { %v1579_v22 = vmax.f32 %v1574_v19, 0.0  ;;  %v2100_v23 = vpop.f32.mrb[23].mxu0 }
 0xd17   : > { %v1580_v24 = vpack.c.bf16 %v1579_v22, %v1579_v22 }
 0xd19   : > { %2110 = vmatmul.mubr.msk.bf16.vlgmr.msra.gmra.mrb[20].mxu1 %vm1620_vm12, %v1580_v24 }
 0xdec   : > { %v1658_v50 = vpop.f32.mrb[20].mxu1 }
 0xded   : > { %v1659_v26 = vadd.f32 %v1973_v25, %v1658_v50  ;;  %v2111_v27 = vpop.f32.mrb[21].mxu1 }
 0xdee   : > { %v1661_v28 = vpop.f32.mrb[22].mxu1 }
 0xdef   : > { %v1664_v29 = vadd.f32 %v1659_v26, %v1482_v59  ;;  %v2112_v30 = vpop.f32.mrb[23].mxu1 }
 0xdf1   : > { %1665 = vst.msk [vmem:[%s711_s3] sm:$0xff] %vm841_vm3, %v1664_v29 }
 0xdf2   : > { %2846 = shalt.err (!%p2843_p11)
}
 0xdf3   : > { %s2847_s21 = scalar_lea.hbm %s3700_s15, 128  ;;  %s2851_s20 = scalar_lea.hbm %s3860_s4, 512 }
 0xdf4   : > { %p2848_p1 = scmp.ne.s32.totalorder %s3700_s15, %s2847_s21  ;;  %p2852_p3 = scmp.lt.u32.totalorder %s3700_s15, %s3860_s4 }
 0xdf5   : > { %p2853_p2 = scmp.lt.u32.totalorder %s2851_s20, %s2847_s21  ;;  %p2855_p8 = scmp.lt.u32.totalorder %s2847_s21, %s3700_s15 }
 0xdf6   : > { %p2849_p13 = pnand %p2848_p1, %p3861_p9 }
 0xdf7   : > { %p2854_p10 = por %p2853_p2, %p2852_p3 }
 0xdf8   : > { %p2850_p0 = pneg %p2849_p13 }
 0xdf9   : > { %p2856_p12 = por %p2855_p8, %p2854_p10 }
 0xdfb   : > { %p2857_p4 = pnand %p2856_p12, %p2850_p0 }
 0xdfd   : > { %2860 = shalt.err (!%p2857_p4)
}
 0xdfe   : > { %2171 = dma.vmem_to_hbm [thread:$0]  (%p3861_p9), %s3702_s23, 128, %s3700_s15, %s1667_s24  }
 0xdff PF: > { %s3862_s1 = sld [smem:[#allocation38_spill]]  ;;  %p2253_p7 = scmp.ge.s32.totalorder %s2983_s28, 2 }
 0xe00   : > { %p3863_p6 = scmp.ne.s32.totalorder %s3846_s5, 0 }
 0xe02   : > { %p2221_p5 = pnand %p2253_p7, %p3863_p6 }
 0xe05   : > { %s1694_s17 = sand.u32 1, %s3862_s1  }
 0xe06   : > { %s1695_s8 = scalar_lea.sflag [#allocation6], %s1694_s17 }
 0xe07   : > { %2938 = dma.done.wait (!%p2221_p5), %s1695_s8, 128  }
 0xe08   : > { %2940 = vsyncadd (!%p2221_p5), %s1695_s8, 4294967168  ;;  %s38_s28 = sadd.s32 1, %s2983_s28   ;;  %s3864_s18 = sld [smem:[#allocation39_spill]] }
 0xe09   : > { %p35_p11 = scmp.ge.s32.totalorder %s38_s28, 6   ;;  %s3865_s19 = sld [smem:[#allocation40_spill]] }
 0xe0a   : > { %s3866_s21 = sld [smem:[#allocation42_spill]]  ;;  %s3867_s22 = sld [smem:[#allocation43_spill]] }
 0xe0b   : > { %s3868_s25 = sld [smem:[#allocation46_spill]]  ;;  %s3869_s20 = smov %s3881_s27 }
 0xe0c   : > { %s3870_s23 = smov %s3497_s2  ;;  %s3871_s24 = smov %s2975_s26 }
 0xe0d   : > { %s3872_s26 = smov %s3875_s29  ;;  %s3873_s27 = smov %s3879_s16 }
 0xe0e   :  { %37 = sbr.rel (!%p35_p11) target bundleno = 27 (0x1b), region = 186 }
 0xe15   :  { %1700 = vsyncpa [#allocation5], 1 }
 0xe16   :  { %1702 = vsyncpa [#allocation5 + $0x1], 1 }
 0xe17   :  { %1703 = vsyncpa [#allocation8], 1 }
 0xe18   :  { %1704 = vsyncpa [#allocation11], 1 }
 0xe19   :  { %1705 = vsyncpa [#allocation14], 1 }
 0xe1a   :  { %1706 = vsyncpa [#allocation17], 1 }
 0xe1b   :  { %1707 = vsyncpa [#allocation20], 1 }
 0xe1c   :  { %1708 = vsyncpa [#allocation23], 1 }
 0xe1d   :  { %1709 = vsyncpa [#allocation26], 1 }
 0xe1e   :  { %1710 = vsyncpa [#allocation6], 1 }
 0xe1f   :  { %1712 = vsyncpa [#allocation6 + $0x1], 1 }

</bundles_post_ra>
